<compile_context>
chip_gen: v6e
topology: v6e:2x2x1
jax: 0.10.0
libtpu: 0.0.40
codegen_flags: <defaults>
</compile_context>

<pallas_src>
import numpy as np
import jax
import jax.numpy as jnp
from jax import lax
from jax.experimental import pallas as pl
from jax.experimental.pallas import tpu as pltpu

# -----------------------------------------------------------------------------
# db6 wavelet filters (pywt / pytorch_wavelets convention)
# -----------------------------------------------------------------------------
_REC_LO = np.array([
    0.11154074335008017, 0.4946238903983854, 0.7511339080215775,
    0.3152503517092432, -0.22626469396516913, -0.12976686756709563,
    0.09750160558707936, 0.02752286553001629, -0.031582039318031156,
    0.0005538422009938016, 0.004777257511010651, -0.00107730108499558,
], dtype=np.float64)
_L = int(_REC_LO.size)                               # 12 taps
_DEC_LO = _REC_LO[::-1]
_DEC_HI = np.array([(-1.0) ** (n + 1) * _REC_LO[n] for n in range(_L)])
_REC_HI = _DEC_HI[::-1]

# analysis correlation kernels == pytorch_wavelets' reversed decomposition filters
_A_LO = [float(v) for v in _DEC_LO[::-1]]            # == rec_lo
_A_HI = [float(v) for v in _DEC_HI[::-1]]            # == rec_hi
# synthesis (transposed-conv) filters
_G0 = [float(v) for v in _REC_LO]
_G1 = [float(v) for v in _REC_HI]

_HALF = _L // 2                                      # 6


# -----------------------------------------------------------------------------
# Pallas kernels
# -----------------------------------------------------------------------------
def _make_dwt_kernel(nout):
    """Polyphase analysis filter bank (stride-2 correlation with dec filters).

    Refs are per-batch tiles: xe/xo (1, C, nout+HALF-1), lo/hi (1, C, nout).
    """
    def kernel(xe_ref, xo_ref, lo_ref, hi_ref):
        xe = xe_ref[...]
        xo = xo_ref[...]
        # first-tap init (no zeros + add)
        e = xe[:, :, 0:nout]
        o = xo[:, :, 0:nout]
        lo = e * _A_LO[0] + o * _A_LO[1]
        hi = e * _A_HI[0] + o * _A_HI[1]
        for j in range(1, _HALF):                    # static unroll, 5 more taps
            e = xe[:, :, j:j + nout]
            o = xo[:, :, j:j + nout]
            lo = lo + e * _A_LO[2 * j] + o * _A_LO[2 * j + 1]
            hi = hi + e * _A_HI[2 * j] + o * _A_HI[2 * j + 1]
        lo_ref[...] = lo
        hi_ref[...] = hi
    return kernel


def _compl_mul_kernel(xt_ref, wt_ref, out_ref):
    """einsum('bix,iox->box') tile, pre-transposed so the MXU does the work.

    xt (bx, B, I) x wt (bx, I, O) -> (bx, B, O); contraction over I, batched
    over the wavelet-mode axis, f32 accumulation.
    NOTE: on v6e/v7x, casting operands to bf16 (f32 accumulation kept) would
    roughly double MXU throughput; kept f32 so the same code is optimal on v5e
    and bit-matches the f32 reference.
    """
    out_ref[...] = lax.dot_general(
        xt_ref[...], wt_ref[...],
        dimension_numbers=(((2,), (1,)), ((0,), (0,))),
        preferred_element_type=jnp.float32)


def _make_idwt_kernel(m):
    """Polyphase synthesis filter bank (transposed conv, stride 2, pad L-2).

    Refs are per-batch tiles: lo/hi (1, C, Lin), ye/yo (1, C, m).
    """
    def kernel(lo_ref, hi_ref, ye_ref, yo_ref):
        lo = lo_ref[...]
        hi = hi_ref[...]
        # first-tap init (j = 0, offset HALF-1)
        off0 = _HALF - 1
        ls = lo[:, :, off0:off0 + m]
        hs = hi[:, :, off0:off0 + m]
        ye = ls * _G0[0] + hs * _G1[0]
        yo = ls * _G0[1] + hs * _G1[1]
        for j in range(1, _HALF):
            off = _HALF - 1 - j
            ls = lo[:, :, off:off + m]
            hs = hi[:, :, off:off + m]
            ye = ye + ls * _G0[2 * j] + hs * _G1[2 * j]
            yo = yo + ls * _G0[2 * j + 1] + hs * _G1[2 * j + 1]
        ye_ref[...] = ye
        yo_ref[...] = yo
    return kernel


# -----------------------------------------------------------------------------
# Wrappers (grid / BlockSpec setup + thin XLA glue)
# -----------------------------------------------------------------------------
def dwt_step(x):
    """One level of DWT1D(wave='db6', mode='symmetric'). x: (B, C, N) f32."""
    B, C, N = x.shape
    nout = (N + _L - 1) // 2                         # pywt dwt_coeff_len, symmetric
    p = 2 * (nout - 1) - N + _L
    # symmetric pad + even/odd polyphase split (plain-XLA layout plumbing)
    xp = jnp.pad(x, ((0, 0), (0, 0), (p // 2, (p + 1) // 2)), mode="symmetric")
    xe = xp[..., ::2]                                # (B, C, nout + HALF - 1)
    xo = xp[..., 1::2]
    W = nout + _HALF - 1

    flops = 8 * _HALF * B * C * nout
    bytes_accessed = 4 * (2 * B * C * W + 2 * B * C * nout)

    lo, hi = pl.pallas_call(
        _make_dwt_kernel(nout),
        grid=(B,),                                   # batch-tiled, pipelined
        in_specs=[pl.BlockSpec((1, C, W), lambda b: (b, 0, 0)),
                  pl.BlockSpec((1, C, W), lambda b: (b, 0, 0))],
        out_specs=(pl.BlockSpec((1, C, nout), lambda b: (b, 0, 0)),
                   pl.BlockSpec((1, C, nout), lambda b: (b, 0, 0))),
        out_shape=(jax.ShapeDtypeStruct((B, C, nout), jnp.float32),
                   jax.ShapeDtypeStruct((B, C, nout), jnp.float32)),
        compiler_params=pltpu.CompilerParams(dimension_semantics=("parallel",)),
        cost_estimate=pl.CostEstimate(flops=flops, transcendentals=0,
                                      bytes_accessed=bytes_accessed),
    )(xe, xo)
    return lo, hi


def compl_mul1d(x_ft, weights):
    """einsum('bix,iox->box') on the MXU.  x_ft: (B, I, X), weights: (I, O, X)."""
    B, I, X = x_ft.shape
    O = weights.shape[1]
    assert weights.shape[2] == X, (weights.shape, X)

    # Layout plumbing outside the kernel: batch the contraction over the
    # wavelet-mode axis X ->  (X, B, I) @ (X, I, O) = (X, B, O).
    xt = jnp.transpose(x_ft, (2, 0, 1))
    wt = jnp.transpose(weights, (2, 0, 1))

    bx = min(X, 256)                                 # mode-axis tile
    grid = (pl.cdiv(X, bx),)
    flops = 2 * B * I * O * X
    bytes_accessed = 4 * (B * I * X + I * O * X + B * O * X)

    out_t = pl.pallas_call(
        _compl_mul_kernel,
        grid=grid,
        in_specs=[pl.BlockSpec((bx, B, I), lambda i: (i, 0, 0)),
                  pl.BlockSpec((bx, I, O), lambda i: (i, 0, 0))],
        out_specs=pl.BlockSpec((bx, B, O), lambda i: (i, 0, 0)),
        out_shape=jax.ShapeDtypeStruct((X, B, O), jnp.float32),
        compiler_params=pltpu.CompilerParams(dimension_semantics=("parallel",)),
        cost_estimate=pl.CostEstimate(flops=flops, transcendentals=0,
                                      bytes_accessed=bytes_accessed),
    )(xt, wt)
    return jnp.transpose(out_t, (1, 2, 0))           # back to (B, O, X)


def idwt_step(lo, hi):
    """One level of IDWT1D(wave='db6', mode='symmetric'). lo, hi: (B, C, Lin)."""
    B, C, Lin = lo.shape
    m = Lin - (_HALF - 1)                            # output length = 2*m = 2*Lin - L + 2

    flops = 8 * _HALF * B * C * m
    bytes_accessed = 4 * (2 * B * C * Lin + 2 * B * C * m)

    ye, yo = pl.pallas_call(
        _make_idwt_kernel(m),
        grid=(B,),
        in_specs=[pl.BlockSpec((1, C, Lin), lambda b: (b, 0, 0)),
                  pl.BlockSpec((1, C, Lin), lambda b: (b, 0, 0))],
        out_specs=(pl.BlockSpec((1, C, m), lambda b: (b, 0, 0)),
                   pl.BlockSpec((1, C, m), lambda b: (b, 0, 0))),
        out_shape=(jax.ShapeDtypeStruct((B, C, m), jnp.float32),
                   jax.ShapeDtypeStruct((B, C, m), jnp.float32)),
        compiler_params=pltpu.CompilerParams(dimension_semantics=("parallel",)),
        cost_estimate=pl.CostEstimate(flops=flops, transcendentals=0,
                                      bytes_accessed=bytes_accessed),
    )(lo, hi)
    # interleave even/odd output phases: y[..., 2n] = ye[n], y[..., 2n+1] = yo[n]
    y = jnp.stack([ye, yo], axis=-1).reshape(B, C, 2 * m)
    return y


def wave_conv1d_forward(x, weights1, level):
    """Forward pass of WaveConv1d. x: (B, C_in, N) float32."""
    # --- DWT1D, J = level, db6, symmetric ---
    x0 = x
    highs = []
    for _ in range(level):
        x0, x1 = dwt_step(x0)
        highs.append(x1)
    x_ft = x0                                        # (B, C_in, modes1)

    # coarsest detail band must share the approximation / weight length
    assert highs[-1].shape[-1] == x_ft.shape[-1] == weights1.shape[-1], (
        highs[-1].shape, x_ft.shape, weights1.shape)

    # --- learned linear transform in the wavelet domain (MXU) ---
    out_ft = compl_mul1d(x_ft, weights1)             # (B, C_out, modes1)
    highs[-1] = compl_mul1d(highs[-1], weights1)

    # --- IDWT1D, db6, symmetric ---
    x0 = out_ft
    for x1 in highs[::-1]:
        if x0.shape[-1] > x1.shape[-1]:              # pytorch_wavelets length reconciliation
            x0 = x0[..., :-1]
        x0 = idwt_step(x0, x1)
    return x0


def dwt_len_after_levels(n, level):
    for _ in range(level):
        n = (n + _L - 1) // 2
    return n


# -----------------------------------------------------------------------------
# Demo
# -----------------------------------------------------------------------------
if __name__ == "__main__":
    B, C_IN, C_OUT, N, LEVEL = 2, 4, 4, 64, 2

    key = jax.random.PRNGKey(0)
    kx, kw = jax.random.split(key)

    x = jax.random.normal(kx, (B, C_IN, N), dtype=jnp.float32)

    # modes1 is the approximation length after `LEVEL` db6 DWT levels
    # (the PyTorch module computes it by running the DWT on a dummy tensor).
    modes1 = dwt_len_after_levels(N, LEVEL)          # 24 for N=64, level=2
    scale = 1.0 / (C_IN * C_OUT)
    weights1 = scale * jax.random.uniform(kw, (C_IN, C_OUT, modes1),
                                          dtype=jnp.float32)

    fwd = jax.jit(wave_conv1d_forward, static_argnums=2)
    y = fwd(x, weights1, LEVEL)
    y = jax.block_until_ready(y)

    assert y.shape == (B, C_OUT, N), y.shape
    assert bool(jnp.all(jnp.isfinite(y)))
    print("KERNEL_OK")
</pallas_src>

<mosaic_0001>
module attributes {stable_mosaic.version = 11 : i64} {
  func.func @kernel(%arg0: i32, %arg1: memref<1x4x42xf32, #tpu.memory_space<vmem>>, %arg2: memref<1x4x42xf32, #tpu.memory_space<vmem>>, %arg3: memref<1x4x37xf32, #tpu.memory_space<vmem>>, %arg4: memref<1x4x37xf32, #tpu.memory_space<vmem>>) attributes {dimension_semantics = [#tpu.dimension_semantics<parallel>], iteration_bounds = array<i64: 2>, scalar_prefetch = 0 : i64, scratch_operands = 0 : i64, tpu.core_type = #tpu.core_type<tc>, window_params = [{transform_indices = @transform_0, window_bounds = array<i64: 1, 4, 42>}, {transform_indices = @transform_1, window_bounds = array<i64: 1, 4, 42>}, {transform_indices = @transform_2, window_bounds = array<i64: 1, 4, 37>}, {transform_indices = @transform_3, window_bounds = array<i64: 1, 4, 37>}]} {
    %c0 = arith.constant 0 : index
    %c0_0 = arith.constant 0 : index
    %c0_1 = arith.constant 0 : index
    %0 = vector.load %arg1[%c0, %c0_0, %c0_1] : memref<1x4x42xf32, #tpu.memory_space<vmem>>, vector<1x4x42xf32>
    %c0_2 = arith.constant 0 : index
    %c0_3 = arith.constant 0 : index
    %c0_4 = arith.constant 0 : index
    %1 = vector.load %arg2[%c0_2, %c0_3, %c0_4] : memref<1x4x42xf32, #tpu.memory_space<vmem>>, vector<1x4x42xf32>
    %2 = vector.extract_strided_slice %0 {offsets = [0, 0, 0], sizes = [1, 4, 37], strides = [1, 1, 1]} : vector<1x4x42xf32> to vector<1x4x37xf32>
    %3 = vector.extract_strided_slice %1 {offsets = [0, 0, 0], sizes = [1, 4, 37], strides = [1, 1, 1]} : vector<1x4x42xf32> to vector<1x4x37xf32>
    %cst = arith.constant 0.111540742 : f32
    %4 = vector.broadcast %cst : f32 to vector<1x4x37xf32>
    %5 = arith.mulf %2, %4 : vector<1x4x37xf32>
    %cst_5 = arith.constant 0.494623899 : f32
    %6 = vector.broadcast %cst_5 : f32 to vector<1x4x37xf32>
    %7 = arith.mulf %3, %6 : vector<1x4x37xf32>
    %8 = arith.addf %5, %7 : vector<1x4x37xf32>
    %cst_6 = arith.constant -0.0010773011 : f32
    %9 = vector.broadcast %cst_6 : f32 to vector<1x4x37xf32>
    %10 = arith.mulf %2, %9 : vector<1x4x37xf32>
    %cst_7 = arith.constant -0.00477725733 : f32
    %11 = vector.broadcast %cst_7 : f32 to vector<1x4x37xf32>
    %12 = arith.mulf %3, %11 : vector<1x4x37xf32>
    %13 = arith.addf %10, %12 : vector<1x4x37xf32>
    %14 = vector.extract_strided_slice %0 {offsets = [0, 0, 1], sizes = [1, 4, 37], strides = [1, 1, 1]} : vector<1x4x42xf32> to vector<1x4x37xf32>
    %15 = vector.extract_strided_slice %1 {offsets = [0, 0, 1], sizes = [1, 4, 37], strides = [1, 1, 1]} : vector<1x4x42xf32> to vector<1x4x37xf32>
    %cst_8 = arith.constant 0.751133918 : f32
    %16 = vector.broadcast %cst_8 : f32 to vector<1x4x37xf32>
    %17 = arith.mulf %14, %16 : vector<1x4x37xf32>
    %18 = arith.addf %8, %17 : vector<1x4x37xf32>
    %cst_9 = arith.constant 0.315250337 : f32
    %19 = vector.broadcast %cst_9 : f32 to vector<1x4x37xf32>
    %20 = arith.mulf %15, %19 : vector<1x4x37xf32>
    %21 = arith.addf %18, %20 : vector<1x4x37xf32>
    %cst_10 = arith.constant 5.53842227E-4 : f32
    %22 = vector.broadcast %cst_10 : f32 to vector<1x4x37xf32>
    %23 = arith.mulf %14, %22 : vector<1x4x37xf32>
    %24 = arith.addf %13, %23 : vector<1x4x37xf32>
    %cst_11 = arith.constant 0.0315820388 : f32
    %25 = vector.broadcast %cst_11 : f32 to vector<1x4x37xf32>
    %26 = arith.mulf %15, %25 : vector<1x4x37xf32>
    %27 = arith.addf %24, %26 : vector<1x4x37xf32>
    %28 = vector.extract_strided_slice %0 {offsets = [0, 0, 2], sizes = [1, 4, 37], strides = [1, 1, 1]} : vector<1x4x42xf32> to vector<1x4x37xf32>
    %29 = vector.extract_strided_slice %1 {offsets = [0, 0, 2], sizes = [1, 4, 37], strides = [1, 1, 1]} : vector<1x4x42xf32> to vector<1x4x37xf32>
    %cst_12 = arith.constant -0.2262647 : f32
    %30 = vector.broadcast %cst_12 : f32 to vector<1x4x37xf32>
    %31 = arith.mulf %28, %30 : vector<1x4x37xf32>
    %32 = arith.addf %21, %31 : vector<1x4x37xf32>
    %cst_13 = arith.constant -0.129766867 : f32
    %33 = vector.broadcast %cst_13 : f32 to vector<1x4x37xf32>
    %34 = arith.mulf %29, %33 : vector<1x4x37xf32>
    %35 = arith.addf %32, %34 : vector<1x4x37xf32>
    %cst_14 = arith.constant 0.0275228657 : f32
    %36 = vector.broadcast %cst_14 : f32 to vector<1x4x37xf32>
    %37 = arith.mulf %28, %36 : vector<1x4x37xf32>
    %38 = arith.addf %27, %37 : vector<1x4x37xf32>
    %cst_15 = arith.constant -0.0975016057 : f32
    %39 = vector.broadcast %cst_15 : f32 to vector<1x4x37xf32>
    %40 = arith.mulf %29, %39 : vector<1x4x37xf32>
    %41 = arith.addf %38, %40 : vector<1x4x37xf32>
    %42 = vector.extract_strided_slice %0 {offsets = [0, 0, 3], sizes = [1, 4, 37], strides = [1, 1, 1]} : vector<1x4x42xf32> to vector<1x4x37xf32>
    %43 = vector.extract_strided_slice %1 {offsets = [0, 0, 3], sizes = [1, 4, 37], strides = [1, 1, 1]} : vector<1x4x42xf32> to vector<1x4x37xf32>
    %cst_16 = arith.constant 0.0975016057 : f32
    %44 = vector.broadcast %cst_16 : f32 to vector<1x4x37xf32>
    %45 = arith.mulf %42, %44 : vector<1x4x37xf32>
    %46 = arith.addf %35, %45 : vector<1x4x37xf32>
    %cst_17 = arith.constant 0.0275228657 : f32
    %47 = vector.broadcast %cst_17 : f32 to vector<1x4x37xf32>
    %48 = arith.mulf %43, %47 : vector<1x4x37xf32>
    %49 = arith.addf %46, %48 : vector<1x4x37xf32>
    %cst_18 = arith.constant -0.129766867 : f32
    %50 = vector.broadcast %cst_18 : f32 to vector<1x4x37xf32>
    %51 = arith.mulf %42, %50 : vector<1x4x37xf32>
    %52 = arith.addf %41, %51 : vector<1x4x37xf32>
    %cst_19 = arith.constant 0.2262647 : f32
    %53 = vector.broadcast %cst_19 : f32 to vector<1x4x37xf32>
    %54 = arith.mulf %43, %53 : vector<1x4x37xf32>
    %55 = arith.addf %52, %54 : vector<1x4x37xf32>
    %56 = vector.extract_strided_slice %0 {offsets = [0, 0, 4], sizes = [1, 4, 37], strides = [1, 1, 1]} : vector<1x4x42xf32> to vector<1x4x37xf32>
    %57 = vector.extract_strided_slice %1 {offsets = [0, 0, 4], sizes = [1, 4, 37], strides = [1, 1, 1]} : vector<1x4x42xf32> to vector<1x4x37xf32>
    %cst_20 = arith.constant -0.0315820388 : f32
    %58 = vector.broadcast %cst_20 : f32 to vector<1x4x37xf32>
    %59 = arith.mulf %56, %58 : vector<1x4x37xf32>
    %60 = arith.addf %49, %59 : vector<1x4x37xf32>
    %cst_21 = arith.constant 5.53842227E-4 : f32
    %61 = vector.broadcast %cst_21 : f32 to vector<1x4x37xf32>
    %62 = arith.mulf %57, %61 : vector<1x4x37xf32>
    %63 = arith.addf %60, %62 : vector<1x4x37xf32>
    %cst_22 = arith.constant 0.315250337 : f32
    %64 = vector.broadcast %cst_22 : f32 to vector<1x4x37xf32>
    %65 = arith.mulf %56, %64 : vector<1x4x37xf32>
    %66 = arith.addf %55, %65 : vector<1x4x37xf32>
    %cst_23 = arith.constant -0.751133918 : f32
    %67 = vector.broadcast %cst_23 : f32 to vector<1x4x37xf32>
    %68 = arith.mulf %57, %67 : vector<1x4x37xf32>
    %69 = arith.addf %66, %68 : vector<1x4x37xf32>
    %70 = vector.extract_strided_slice %0 {offsets = [0, 0, 5], sizes = [1, 4, 37], strides = [1, 1, 1]} : vector<1x4x42xf32> to vector<1x4x37xf32>
    %71 = vector.extract_strided_slice %1 {offsets = [0, 0, 5], sizes = [1, 4, 37], strides = [1, 1, 1]} : vector<1x4x42xf32> to vector<1x4x37xf32>
    %cst_24 = arith.constant 0.00477725733 : f32
    %72 = vector.broadcast %cst_24 : f32 to vector<1x4x37xf32>
    %73 = arith.mulf %70, %72 : vector<1x4x37xf32>
    %74 = arith.addf %63, %73 : vector<1x4x37xf32>
    %cst_25 = arith.constant -0.0010773011 : f32
    %75 = vector.broadcast %cst_25 : f32 to vector<1x4x37xf32>
    %76 = arith.mulf %71, %75 : vector<1x4x37xf32>
    %77 = arith.addf %74, %76 : vector<1x4x37xf32>
    %cst_26 = arith.constant 0.494623899 : f32
    %78 = vector.broadcast %cst_26 : f32 to vector<1x4x37xf32>
    %79 = arith.mulf %70, %78 : vector<1x4x37xf32>
    %80 = arith.addf %69, %79 : vector<1x4x37xf32>
    %cst_27 = arith.constant -0.111540742 : f32
    %81 = vector.broadcast %cst_27 : f32 to vector<1x4x37xf32>
    %82 = arith.mulf %71, %81 : vector<1x4x37xf32>
    %83 = arith.addf %80, %82 : vector<1x4x37xf32>
    %c0_28 = arith.constant 0 : index
    %c0_29 = arith.constant 0 : index
    %c0_30 = arith.constant 0 : index
    %84 = vector.load %arg3[%c0_28, %c0_29, %c0_30] : memref<1x4x37xf32, #tpu.memory_space<vmem>>, vector<1x4x37xf32>
    tpu.vector_store %arg3[%c0_28, %c0_29, %c0_30], %77 {strides = array<i32>} : memref<1x4x37xf32, #tpu.memory_space<vmem>>, vector<1x4x37xf32>,
    %c0_31 = arith.constant 0 : index
    %c0_32 = arith.constant 0 : index
    %c0_33 = arith.constant 0 : index
    %85 = vector.load %arg4[%c0_31, %c0_32, %c0_33] : memref<1x4x37xf32, #tpu.memory_space<vmem>>, vector<1x4x37xf32>
    tpu.vector_store %arg4[%c0_31, %c0_32, %c0_33], %83 {strides = array<i32>} : memref<1x4x37xf32, #tpu.memory_space<vmem>>, vector<1x4x37xf32>,
    return
  }
  func.func @transform_0(%arg0: i32) -> (i32, i32, i32) {
    %c0_i32 = arith.constant 0 : i32
    %c0_i32_0 = arith.constant 0 : i32
    %c0_i32_1 = arith.constant 0 : i32
    return %arg0, %c0_i32, %c0_i32_0 : i32, i32, i32
  }
  func.func @transform_1(%arg0: i32) -> (i32, i32, i32) {
    %c0_i32 = arith.constant 0 : i32
    %c0_i32_0 = arith.constant 0 : i32
    %c0_i32_1 = arith.constant 0 : i32
    return %arg0, %c0_i32, %c0_i32_0 : i32, i32, i32
  }
  func.func @transform_2(%arg0: i32) -> (i32, i32, i32) {
    %c0_i32 = arith.constant 0 : i32
    %c0_i32_0 = arith.constant 0 : i32
    %c0_i32_1 = arith.constant 0 : i32
    return %arg0, %c0_i32, %c0_i32_0 : i32, i32, i32
  }
  func.func @transform_3(%arg0: i32) -> (i32, i32, i32) {
    %c0_i32 = arith.constant 0 : i32
    %c0_i32_0 = arith.constant 0 : i32
    %c0_i32_1 = arith.constant 0 : i32
    return %arg0, %c0_i32, %c0_i32_0 : i32, i32, i32
  }
}

module attributes {stable_mosaic.version = 11 : i64} {
  func.func @_compl_mul_kernel(%arg0: i32, %arg1: memref<24x2x4xf32, #tpu.memory_space<vmem>>, %arg2: memref<24x4x4xf32, #tpu.memory_space<vmem>>, %arg3: memref<24x2x4xf32, #tpu.memory_space<vmem>>) attributes {dimension_semantics = [#tpu.dimension_semantics<parallel>], iteration_bounds = array<i64: 1>, scalar_prefetch = 0 : i64, scratch_operands = 0 : i64, tpu.core_type = #tpu.core_type<tc>, window_params = [{transform_indices = @transform_0, window_bounds = array<i64: 24, 2, 4>}, {transform_indices = @transform_1, window_bounds = array<i64: 24, 4, 4>}, {transform_indices = @transform_2, window_bounds = array<i64: 24, 2, 4>}]} {
    %c0 = arith.constant 0 : index
    %c0_0 = arith.constant 0 : index
    %c0_1 = arith.constant 0 : index
    %0 = vector.load %arg1[%c0, %c0_0, %c0_1] : memref<24x2x4xf32, #tpu.memory_space<vmem>>, vector<24x2x4xf32>
    %c0_2 = arith.constant 0 : index
    %c0_3 = arith.constant 0 : index
    %c0_4 = arith.constant 0 : index
    %1 = vector.load %arg2[%c0_2, %c0_3, %c0_4] : memref<24x4x4xf32, #tpu.memory_space<vmem>>, vector<24x4x4xf32>
    %cst = arith.constant dense<0.000000e+00> : vector<24x2x4xf32>
    %2 = tpu.matmul %0, %1, %cst {dimension_numbers = #tpu.dot_dimension_numbers<[2], [1], [1], [2], [0, 0, 0, 1, 1, 2], [0], [0]>} : vector<24x2x4xf32>, vector<24x4x4xf32>, vector<24x2x4xf32> -> vector<24x2x4xf32>
    %c0_5 = arith.constant 0 : index
    %c0_6 = arith.constant 0 : index
    %c0_7 = arith.constant 0 : index
    %3 = vector.load %arg3[%c0_5, %c0_6, %c0_7] : memref<24x2x4xf32, #tpu.memory_space<vmem>>, vector<24x2x4xf32>
    tpu.vector_store %arg3[%c0_5, %c0_6, %c0_7], %2 {strides = array<i32>} : memref<24x2x4xf32, #tpu.memory_space<vmem>>, vector<24x2x4xf32>,
    return
  }
  func.func @transform_0(%arg0: i32) -> (i32, i32, i32) {
    %c0_i32 = arith.constant 0 : i32
    %c0_i32_0 = arith.constant 0 : i32
    %c0_i32_1 = arith.constant 0 : i32
    return %arg0, %c0_i32, %c0_i32_0 : i32, i32, i32
  }
  func.func @transform_1(%arg0: i32) -> (i32, i32, i32) {
    %c0_i32 = arith.constant 0 : i32
    %c0_i32_0 = arith.constant 0 : i32
    %c0_i32_1 = arith.constant 0 : i32
    return %arg0, %c0_i32, %c0_i32_0 : i32, i32, i32
  }
  func.func @transform_2(%arg0: i32) -> (i32, i32, i32) {
    %c0_i32 = arith.constant 0 : i32
    %c0_i32_0 = arith.constant 0 : i32
    %c0_i32_1 = arith.constant 0 : i32
    return %arg0, %c0_i32, %c0_i32_0 : i32, i32, i32
  }
}

module attributes {stable_mosaic.version = 11 : i64} {
  func.func @kernel(%arg0: i32, %arg1: memref<1x4x29xf32, #tpu.memory_space<vmem>>, %arg2: memref<1x4x29xf32, #tpu.memory_space<vmem>>, %arg3: memref<1x4x24xf32, #tpu.memory_space<vmem>>, %arg4: memref<1x4x24xf32, #tpu.memory_space<vmem>>) attributes {dimension_semantics = [#tpu.dimension_semantics<parallel>], iteration_bounds = array<i64: 2>, scalar_prefetch = 0 : i64, scratch_operands = 0 : i64, tpu.core_type = #tpu.core_type<tc>, window_params = [{transform_indices = @transform_0, window_bounds = array<i64: 1, 4, 29>}, {transform_indices = @transform_1, window_bounds = array<i64: 1, 4, 29>}, {transform_indices = @transform_2, window_bounds = array<i64: 1, 4, 24>}, {transform_indices = @transform_3, window_bounds = array<i64: 1, 4, 24>}]} {
    %c0 = arith.constant 0 : index
    %c0_0 = arith.constant 0 : index
    %c0_1 = arith.constant 0 : index
    %0 = vector.load %arg1[%c0, %c0_0, %c0_1] : memref<1x4x29xf32, #tpu.memory_space<vmem>>, vector<1x4x29xf32>
    %c0_2 = arith.constant 0 : index
    %c0_3 = arith.constant 0 : index
    %c0_4 = arith.constant 0 : index
    %1 = vector.load %arg2[%c0_2, %c0_3, %c0_4] : memref<1x4x29xf32, #tpu.memory_space<vmem>>, vector<1x4x29xf32>
    %2 = vector.extract_strided_slice %0 {offsets = [0, 0, 0], sizes = [1, 4, 24], strides = [1, 1, 1]} : vector<1x4x29xf32> to vector<1x4x24xf32>
    %3 = vector.extract_strided_slice %1 {offsets = [0, 0, 0], sizes = [1, 4, 24], strides = [1, 1, 1]} : vector<1x4x29xf32> to vector<1x4x24xf32>
    %cst = arith.constant 0.111540742 : f32
    %4 = vector.broadcast %cst : f32 to vector<1x4x24xf32>
    %5 = arith.mulf %2, %4 : vector<1x4x24xf32>
    %cst_5 = arith.constant 0.494623899 : f32
    %6 = vector.broadcast %cst_5 : f32 to vector<1x4x24xf32>
    %7 = arith.mulf %3, %6 : vector<1x4x24xf32>
    %8 = arith.addf %5, %7 : vector<1x4x24xf32>
    %cst_6 = arith.constant -0.0010773011 : f32
    %9 = vector.broadcast %cst_6 : f32 to vector<1x4x24xf32>
    %10 = arith.mulf %2, %9 : vector<1x4x24xf32>
    %cst_7 = arith.constant -0.00477725733 : f32
    %11 = vector.broadcast %cst_7 : f32 to vector<1x4x24xf32>
    %12 = arith.mulf %3, %11 : vector<1x4x24xf32>
    %13 = arith.addf %10, %12 : vector<1x4x24xf32>
    %14 = vector.extract_strided_slice %0 {offsets = [0, 0, 1], sizes = [1, 4, 24], strides = [1, 1, 1]} : vector<1x4x29xf32> to vector<1x4x24xf32>
    %15 = vector.extract_strided_slice %1 {offsets = [0, 0, 1], sizes = [1, 4, 24], strides = [1, 1, 1]} : vector<1x4x29xf32> to vector<1x4x24xf32>
    %cst_8 = arith.constant 0.751133918 : f32
    %16 = vector.broadcast %cst_8 : f32 to vector<1x4x24xf32>
    %17 = arith.mulf %14, %16 : vector<1x4x24xf32>
    %18 = arith.addf %8, %17 : vector<1x4x24xf32>
    %cst_9 = arith.constant 0.315250337 : f32
    %19 = vector.broadcast %cst_9 : f32 to vector<1x4x24xf32>
    %20 = arith.mulf %15, %19 : vector<1x4x24xf32>
    %21 = arith.addf %18, %20 : vector<1x4x24xf32>
    %cst_10 = arith.constant 5.53842227E-4 : f32
    %22 = vector.broadcast %cst_10 : f32 to vector<1x4x24xf32>
    %23 = arith.mulf %14, %22 : vector<1x4x24xf32>
    %24 = arith.addf %13, %23 : vector<1x4x24xf32>
    %cst_11 = arith.constant 0.0315820388 : f32
    %25 = vector.broadcast %cst_11 : f32 to vector<1x4x24xf32>
    %26 = arith.mulf %15, %25 : vector<1x4x24xf32>
    %27 = arith.addf %24, %26 : vector<1x4x24xf32>
    %28 = vector.extract_strided_slice %0 {offsets = [0, 0, 2], sizes = [1, 4, 24], strides = [1, 1, 1]} : vector<1x4x29xf32> to vector<1x4x24xf32>
    %29 = vector.extract_strided_slice %1 {offsets = [0, 0, 2], sizes = [1, 4, 24], strides = [1, 1, 1]} : vector<1x4x29xf32> to vector<1x4x24xf32>
    %cst_12 = arith.constant -0.2262647 : f32
    %30 = vector.broadcast %cst_12 : f32 to vector<1x4x24xf32>
    %31 = arith.mulf %28, %30 : vector<1x4x24xf32>
    %32 = arith.addf %21, %31 : vector<1x4x24xf32>
    %cst_13 = arith.constant -0.129766867 : f32
    %33 = vector.broadcast %cst_13 : f32 to vector<1x4x24xf32>
    %34 = arith.mulf %29, %33 : vector<1x4x24xf32>
    %35 = arith.addf %32, %34 : vector<1x4x24xf32>
    %cst_14 = arith.constant 0.0275228657 : f32
    %36 = vector.broadcast %cst_14 : f32 to vector<1x4x24xf32>
    %37 = arith.mulf %28, %36 : vector<1x4x24xf32>
    %38 = arith.addf %27, %37 : vector<1x4x24xf32>
    %cst_15 = arith.constant -0.0975016057 : f32
    %39 = vector.broadcast %cst_15 : f32 to vector<1x4x24xf32>
    %40 = arith.mulf %29, %39 : vector<1x4x24xf32>
    %41 = arith.addf %38, %40 : vector<1x4x24xf32>
    %42 = vector.extract_strided_slice %0 {offsets = [0, 0, 3], sizes = [1, 4, 24], strides = [1, 1, 1]} : vector<1x4x29xf32> to vector<1x4x24xf32>
    %43 = vector.extract_strided_slice %1 {offsets = [0, 0, 3], sizes = [1, 4, 24], strides = [1, 1, 1]} : vector<1x4x29xf32> to vector<1x4x24xf32>
    %cst_16 = arith.constant 0.0975016057 : f32
    %44 = vector.broadcast %cst_16 : f32 to vector<1x4x24xf32>
    %45 = arith.mulf %42, %44 : vector<1x4x24xf32>
    %46 = arith.addf %35, %45 : vector<1x4x24xf32>
    %cst_17 = arith.constant 0.0275228657 : f32
    %47 = vector.broadcast %cst_17 : f32 to vector<1x4x24xf32>
    %48 = arith.mulf %43, %47 : vector<1x4x24xf32>
    %49 = arith.addf %46, %48 : vector<1x4x24xf32>
    %cst_18 = arith.constant -0.129766867 : f32
    %50 = vector.broadcast %cst_18 : f32 to vector<1x4x24xf32>
    %51 = arith.mulf %42, %50 : vector<1x4x24xf32>
    %52 = arith.addf %41, %51 : vector<1x4x24xf32>
    %cst_19 = arith.constant 0.2262647 : f32
    %53 = vector.broadcast %cst_19 : f32 to vector<1x4x24xf32>
    %54 = arith.mulf %43, %53 : vector<1x4x24xf32>
    %55 = arith.addf %52, %54 : vector<1x4x24xf32>
    %56 = vector.extract_strided_slice %0 {offsets = [0, 0, 4], sizes = [1, 4, 24], strides = [1, 1, 1]} : vector<1x4x29xf32> to vector<1x4x24xf32>
    %57 = vector.extract_strided_slice %1 {offsets = [0, 0, 4], sizes = [1, 4, 24], strides = [1, 1, 1]} : vector<1x4x29xf32> to vector<1x4x24xf32>
    %cst_20 = arith.constant -0.0315820388 : f32
    %58 = vector.broadcast %cst_20 : f32 to vector<1x4x24xf32>
    %59 = arith.mulf %56, %58 : vector<1x4x24xf32>
    %60 = arith.addf %49, %59 : vector<1x4x24xf32>
    %cst_21 = arith.constant 5.53842227E-4 : f32
    %61 = vector.broadcast %cst_21 : f32 to vector<1x4x24xf32>
    %62 = arith.mulf %57, %61 : vector<1x4x24xf32>
    %63 = arith.addf %60, %62 : vector<1x4x24xf32>
    %cst_22 = arith.constant 0.315250337 : f32
    %64 = vector.broadcast %cst_22 : f32 to vector<1x4x24xf32>
    %65 = arith.mulf %56, %64 : vector<1x4x24xf32>
    %66 = arith.addf %55, %65 : vector<1x4x24xf32>
    %cst_23 = arith.constant -0.751133918 : f32
    %67 = vector.broadcast %cst_23 : f32 to vector<1x4x24xf32>
    %68 = arith.mulf %57, %67 : vector<1x4x24xf32>
    %69 = arith.addf %66, %68 : vector<1x4x24xf32>
    %70 = vector.extract_strided_slice %0 {offsets = [0, 0, 5], sizes = [1, 4, 24], strides = [1, 1, 1]} : vector<1x4x29xf32> to vector<1x4x24xf32>
    %71 = vector.extract_strided_slice %1 {offsets = [0, 0, 5], sizes = [1, 4, 24], strides = [1, 1, 1]} : vector<1x4x29xf32> to vector<1x4x24xf32>
    %cst_24 = arith.constant 0.00477725733 : f32
    %72 = vector.broadcast %cst_24 : f32 to vector<1x4x24xf32>
    %73 = arith.mulf %70, %72 : vector<1x4x24xf32>
    %74 = arith.addf %63, %73 : vector<1x4x24xf32>
    %cst_25 = arith.constant -0.0010773011 : f32
    %75 = vector.broadcast %cst_25 : f32 to vector<1x4x24xf32>
    %76 = arith.mulf %71, %75 : vector<1x4x24xf32>
    %77 = arith.addf %74, %76 : vector<1x4x24xf32>
    %cst_26 = arith.constant 0.494623899 : f32
    %78 = vector.broadcast %cst_26 : f32 to vector<1x4x24xf32>
    %79 = arith.mulf %70, %78 : vector<1x4x24xf32>
    %80 = arith.addf %69, %79 : vector<1x4x24xf32>
    %cst_27 = arith.constant -0.111540742 : f32
    %81 = vector.broadcast %cst_27 : f32 to vector<1x4x24xf32>
    %82 = arith.mulf %71, %81 : vector<1x4x24xf32>
    %83 = arith.addf %80, %82 : vector<1x4x24xf32>
    %c0_28 = arith.constant 0 : index
    %c0_29 = arith.constant 0 : index
    %c0_30 = arith.constant 0 : index
    %84 = vector.load %arg3[%c0_28, %c0_29, %c0_30] : memref<1x4x24xf32, #tpu.memory_space<vmem>>, vector<1x4x24xf32>
    tpu.vector_store %arg3[%c0_28, %c0_29, %c0_30], %77 {strides = array<i32>} : memref<1x4x24xf32, #tpu.memory_space<vmem>>, vector<1x4x24xf32>,
    %c0_31 = arith.constant 0 : index
    %c0_32 = arith.constant 0 : index
    %c0_33 = arith.constant 0 : index
    %85 = vector.load %arg4[%c0_31, %c0_32, %c0_33] : memref<1x4x24xf32, #tpu.memory_space<vmem>>, vector<1x4x24xf32>
    tpu.vector_store %arg4[%c0_31, %c0_32, %c0_33], %83 {strides = array<i32>} : memref<1x4x24xf32, #tpu.memory_space<vmem>>, vector<1x4x24xf32>,
    return
  }
  func.func @transform_0(%arg0: i32) -> (i32, i32, i32) {
    %c0_i32 = arith.constant 0 : i32
    %c0_i32_0 = arith.constant 0 : i32
    %c0_i32_1 = arith.constant 0 : i32
    return %arg0, %c0_i32, %c0_i32_0 : i32, i32, i32
  }
  func.func @transform_1(%arg0: i32) -> (i32, i32, i32) {
    %c0_i32 = arith.constant 0 : i32
    %c0_i32_0 = arith.constant 0 : i32
    %c0_i32_1 = arith.constant 0 : i32
    return %arg0, %c0_i32, %c0_i32_0 : i32, i32, i32
  }
  func.func @transform_2(%arg0: i32) -> (i32, i32, i32) {
    %c0_i32 = arith.constant 0 : i32
    %c0_i32_0 = arith.constant 0 : i32
    %c0_i32_1 = arith.constant 0 : i32
    return %arg0, %c0_i32, %c0_i32_0 : i32, i32, i32
  }
  func.func @transform_3(%arg0: i32) -> (i32, i32, i32) {
    %c0_i32 = arith.constant 0 : i32
    %c0_i32_0 = arith.constant 0 : i32
    %c0_i32_1 = arith.constant 0 : i32
    return %arg0, %c0_i32, %c0_i32_0 : i32, i32, i32
  }
}

module attributes {stable_mosaic.version = 11 : i64} {
  func.func @kernel(%arg0: i32, %arg1: memref<1x4x24xf32, #tpu.memory_space<vmem>>, %arg2: memref<1x4x24xf32, #tpu.memory_space<vmem>>, %arg3: memref<1x4x19xf32, #tpu.memory_space<vmem>>, %arg4: memref<1x4x19xf32, #tpu.memory_space<vmem>>) attributes {dimension_semantics = [#tpu.dimension_semantics<parallel>], iteration_bounds = array<i64: 2>, scalar_prefetch = 0 : i64, scratch_operands = 0 : i64, tpu.core_type = #tpu.core_type<tc>, window_params = [{transform_indices = @transform_0, window_bounds = array<i64: 1, 4, 24>}, {transform_indices = @transform_1, window_bounds = array<i64: 1, 4, 24>}, {transform_indices = @transform_2, window_bounds = array<i64: 1, 4, 19>}, {transform_indices = @transform_3, window_bounds = array<i64: 1, 4, 19>}]} {
    %c0 = arith.constant 0 : index
    %c0_0 = arith.constant 0 : index
    %c0_1 = arith.constant 0 : index
    %0 = vector.load %arg1[%c0, %c0_0, %c0_1] : memref<1x4x24xf32, #tpu.memory_space<vmem>>, vector<1x4x24xf32>
    %c0_2 = arith.constant 0 : index
    %c0_3 = arith.constant 0 : index
    %c0_4 = arith.constant 0 : index
    %1 = vector.load %arg2[%c0_2, %c0_3, %c0_4] : memref<1x4x24xf32, #tpu.memory_space<vmem>>, vector<1x4x24xf32>
    %2 = vector.extract_strided_slice %0 {offsets = [0, 0, 5], sizes = [1, 4, 19], strides = [1, 1, 1]} : vector<1x4x24xf32> to vector<1x4x19xf32>
    %3 = vector.extract_strided_slice %1 {offsets = [0, 0, 5], sizes = [1, 4, 19], strides = [1, 1, 1]} : vector<1x4x24xf32> to vector<1x4x19xf32>
    %cst = arith.constant 0.111540742 : f32
    %4 = vector.broadcast %cst : f32 to vector<1x4x19xf32>
    %5 = arith.mulf %2, %4 : vector<1x4x19xf32>
    %cst_5 = arith.constant -0.0010773011 : f32
    %6 = vector.broadcast %cst_5 : f32 to vector<1x4x19xf32>
    %7 = arith.mulf %3, %6 : vector<1x4x19xf32>
    %8 = arith.addf %5, %7 : vector<1x4x19xf32>
    %cst_6 = arith.constant 0.494623899 : f32
    %9 = vector.broadcast %cst_6 : f32 to vector<1x4x19xf32>
    %10 = arith.mulf %2, %9 : vector<1x4x19xf32>
    %cst_7 = arith.constant -0.00477725733 : f32
    %11 = vector.broadcast %cst_7 : f32 to vector<1x4x19xf32>
    %12 = arith.mulf %3, %11 : vector<1x4x19xf32>
    %13 = arith.addf %10, %12 : vector<1x4x19xf32>
    %14 = vector.extract_strided_slice %0 {offsets = [0, 0, 4], sizes = [1, 4, 19], strides = [1, 1, 1]} : vector<1x4x24xf32> to vector<1x4x19xf32>
    %15 = vector.extract_strided_slice %1 {offsets = [0, 0, 4], sizes = [1, 4, 19], strides = [1, 1, 1]} : vector<1x4x24xf32> to vector<1x4x19xf32>
    %cst_8 = arith.constant 0.751133918 : f32
    %16 = vector.broadcast %cst_8 : f32 to vector<1x4x19xf32>
    %17 = arith.mulf %14, %16 : vector<1x4x19xf32>
    %18 = arith.addf %8, %17 : vector<1x4x19xf32>
    %cst_9 = arith.constant 5.53842227E-4 : f32
    %19 = vector.broadcast %cst_9 : f32 to vector<1x4x19xf32>
    %20 = arith.mulf %15, %19 : vector<1x4x19xf32>
    %21 = arith.addf %18, %20 : vector<1x4x19xf32>
    %cst_10 = arith.constant 0.315250337 : f32
    %22 = vector.broadcast %cst_10 : f32 to vector<1x4x19xf32>
    %23 = arith.mulf %14, %22 : vector<1x4x19xf32>
    %24 = arith.addf %13, %23 : vector<1x4x19xf32>
    %cst_11 = arith.constant 0.0315820388 : f32
    %25 = vector.broadcast %cst_11 : f32 to vector<1x4x19xf32>
    %26 = arith.mulf %15, %25 : vector<1x4x19xf32>
    %27 = arith.addf %24, %26 : vector<1x4x19xf32>
    %28 = vector.extract_strided_slice %0 {offsets = [0, 0, 3], sizes = [1, 4, 19], strides = [1, 1, 1]} : vector<1x4x24xf32> to vector<1x4x19xf32>
    %29 = vector.extract_strided_slice %1 {offsets = [0, 0, 3], sizes = [1, 4, 19], strides = [1, 1, 1]} : vector<1x4x24xf32> to vector<1x4x19xf32>
    %cst_12 = arith.constant -0.2262647 : f32
    %30 = vector.broadcast %cst_12 : f32 to vector<1x4x19xf32>
    %31 = arith.mulf %28, %30 : vector<1x4x19xf32>
    %32 = arith.addf %21, %31 : vector<1x4x19xf32>
    %cst_13 = arith.constant 0.0275228657 : f32
    %33 = vector.broadcast %cst_13 : f32 to vector<1x4x19xf32>
    %34 = arith.mulf %29, %33 : vector<1x4x19xf32>
    %35 = arith.addf %32, %34 : vector<1x4x19xf32>
    %cst_14 = arith.constant -0.129766867 : f32
    %36 = vector.broadcast %cst_14 : f32 to vector<1x4x19xf32>
    %37 = arith.mulf %28, %36 : vector<1x4x19xf32>
    %38 = arith.addf %27, %37 : vector<1x4x19xf32>
    %cst_15 = arith.constant -0.0975016057 : f32
    %39 = vector.broadcast %cst_15 : f32 to vector<1x4x19xf32>
    %40 = arith.mulf %29, %39 : vector<1x4x19xf32>
    %41 = arith.addf %38, %40 : vector<1x4x19xf32>
    %42 = vector.extract_strided_slice %0 {offsets = [0, 0, 2], sizes = [1, 4, 19], strides = [1, 1, 1]} : vector<1x4x24xf32> to vector<1x4x19xf32>
    %43 = vector.extract_strided_slice %1 {offsets = [0, 0, 2], sizes = [1, 4, 19], strides = [1, 1, 1]} : vector<1x4x24xf32> to vector<1x4x19xf32>
    %cst_16 = arith.constant 0.0975016057 : f32
    %44 = vector.broadcast %cst_16 : f32 to vector<1x4x19xf32>
    %45 = arith.mulf %42, %44 : vector<1x4x19xf32>
    %46 = arith.addf %35, %45 : vector<1x4x19xf32>
    %cst_17 = arith.constant -0.129766867 : f32
    %47 = vector.broadcast %cst_17 : f32 to vector<1x4x19xf32>
    %48 = arith.mulf %43, %47 : vector<1x4x19xf32>
    %49 = arith.addf %46, %48 : vector<1x4x19xf32>
    %cst_18 = arith.constant 0.0275228657 : f32
    %50 = vector.broadcast %cst_18 : f32 to vector<1x4x19xf32>
    %51 = arith.mulf %42, %50 : vector<1x4x19xf32>
    %52 = arith.addf %41, %51 : vector<1x4x19xf32>
    %cst_19 = arith.constant 0.2262647 : f32
    %53 = vector.broadcast %cst_19 : f32 to vector<1x4x19xf32>
    %54 = arith.mulf %43, %53 : vector<1x4x19xf32>
    %55 = arith.addf %52, %54 : vector<1x4x19xf32>
    %56 = vector.extract_strided_slice %0 {offsets = [0, 0, 1], sizes = [1, 4, 19], strides = [1, 1, 1]} : vector<1x4x24xf32> to vector<1x4x19xf32>
    %57 = vector.extract_strided_slice %1 {offsets = [0, 0, 1], sizes = [1, 4, 19], strides = [1, 1, 1]} : vector<1x4x24xf32> to vector<1x4x19xf32>
    %cst_20 = arith.constant -0.0315820388 : f32
    %58 = vector.broadcast %cst_20 : f32 to vector<1x4x19xf32>
    %59 = arith.mulf %56, %58 : vector<1x4x19xf32>
    %60 = arith.addf %49, %59 : vector<1x4x19xf32>
    %cst_21 = arith.constant 0.315250337 : f32
    %61 = vector.broadcast %cst_21 : f32 to vector<1x4x19xf32>
    %62 = arith.mulf %57, %61 : vector<1x4x19xf32>
    %63 = arith.addf %60, %62 : vector<1x4x19xf32>
    %cst_22 = arith.constant 5.53842227E-4 : f32
    %64 = vector.broadcast %cst_22 : f32 to vector<1x4x19xf32>
    %65 = arith.mulf %56, %64 : vector<1x4x19xf32>
    %66 = arith.addf %55, %65 : vector<1x4x19xf32>
    %cst_23 = arith.constant -0.751133918 : f32
    %67 = vector.broadcast %cst_23 : f32 to vector<1x4x19xf32>
    %68 = arith.mulf %57, %67 : vector<1x4x19xf32>
    %69 = arith.addf %66, %68 : vector<1x4x19xf32>
    %70 = vector.extract_strided_slice %0 {offsets = [0, 0, 0], sizes = [1, 4, 19], strides = [1, 1, 1]} : vector<1x4x24xf32> to vector<1x4x19xf32>
    %71 = vector.extract_strided_slice %1 {offsets = [0, 0, 0], sizes = [1, 4, 19], strides = [1, 1, 1]} : vector<1x4x24xf32> to vector<1x4x19xf32>
    %cst_24 = arith.constant 0.00477725733 : f32
    %72 = vector.broadcast %cst_24 : f32 to vector<1x4x19xf32>
    %73 = arith.mulf %70, %72 : vector<1x4x19xf32>
    %74 = arith.addf %63, %73 : vector<1x4x19xf32>
    %cst_25 = arith.constant 0.494623899 : f32
    %75 = vector.broadcast %cst_25 : f32 to vector<1x4x19xf32>
    %76 = arith.mulf %71, %75 : vector<1x4x19xf32>
    %77 = arith.addf %74, %76 : vector<1x4x19xf32>
    %cst_26 = arith.constant -0.0010773011 : f32
    %78 = vector.broadcast %cst_26 : f32 to vector<1x4x19xf32>
    %79 = arith.mulf %70, %78 : vector<1x4x19xf32>
    %80 = arith.addf %69, %79 : vector<1x4x19xf32>
    %cst_27 = arith.constant -0.111540742 : f32
    %81 = vector.broadcast %cst_27 : f32 to vector<1x4x19xf32>
    %82 = arith.mulf %71, %81 : vector<1x4x19xf32>
    %83 = arith.addf %80, %82 : vector<1x4x19xf32>
    %c0_28 = arith.constant 0 : index
    %c0_29 = arith.constant 0 : index
    %c0_30 = arith.constant 0 : index
    %84 = vector.load %arg3[%c0_28, %c0_29, %c0_30] : memref<1x4x19xf32, #tpu.memory_space<vmem>>, vector<1x4x19xf32>
    tpu.vector_store %arg3[%c0_28, %c0_29, %c0_30], %77 {strides = array<i32>} : memref<1x4x19xf32, #tpu.memory_space<vmem>>, vector<1x4x19xf32>,
    %c0_31 = arith.constant 0 : index
    %c0_32 = arith.constant 0 : index
    %c0_33 = arith.constant 0 : index
    %85 = vector.load %arg4[%c0_31, %c0_32, %c0_33] : memref<1x4x19xf32, #tpu.memory_space<vmem>>, vector<1x4x19xf32>
    tpu.vector_store %arg4[%c0_31, %c0_32, %c0_33], %83 {strides = array<i32>} : memref<1x4x19xf32, #tpu.memory_space<vmem>>, vector<1x4x19xf32>,
    return
  }
  func.func @transform_0(%arg0: i32) -> (i32, i32, i32) {
    %c0_i32 = arith.constant 0 : i32
    %c0_i32_0 = arith.constant 0 : i32
    %c0_i32_1 = arith.constant 0 : i32
    return %arg0, %c0_i32, %c0_i32_0 : i32, i32, i32
  }
  func.func @transform_1(%arg0: i32) -> (i32, i32, i32) {
    %c0_i32 = arith.constant 0 : i32
    %c0_i32_0 = arith.constant 0 : i32
    %c0_i32_1 = arith.constant 0 : i32
    return %arg0, %c0_i32, %c0_i32_0 : i32, i32, i32
  }
  func.func @transform_2(%arg0: i32) -> (i32, i32, i32) {
    %c0_i32 = arith.constant 0 : i32
    %c0_i32_0 = arith.constant 0 : i32
    %c0_i32_1 = arith.constant 0 : i32
    return %arg0, %c0_i32, %c0_i32_0 : i32, i32, i32
  }
  func.func @transform_3(%arg0: i32) -> (i32, i32, i32) {
    %c0_i32 = arith.constant 0 : i32
    %c0_i32_0 = arith.constant 0 : i32
    %c0_i32_1 = arith.constant 0 : i32
    return %arg0, %c0_i32, %c0_i32_0 : i32, i32, i32
  }
}

module attributes {stable_mosaic.version = 11 : i64} {
  func.func @kernel(%arg0: i32, %arg1: memref<1x4x37xf32, #tpu.memory_space<vmem>>, %arg2: memref<1x4x37xf32, #tpu.memory_space<vmem>>, %arg3: memref<1x4x32xf32, #tpu.memory_space<vmem>>, %arg4: memref<1x4x32xf32, #tpu.memory_space<vmem>>) attributes {dimension_semantics = [#tpu.dimension_semantics<parallel>], iteration_bounds = array<i64: 2>, scalar_prefetch = 0 : i64, scratch_operands = 0 : i64, tpu.core_type = #tpu.core_type<tc>, window_params = [{transform_indices = @transform_0, window_bounds = array<i64: 1, 4, 37>}, {transform_indices = @transform_1, window_bounds = array<i64: 1, 4, 37>}, {transform_indices = @transform_2, window_bounds = array<i64: 1, 4, 32>}, {transform_indices = @transform_3, window_bounds = array<i64: 1, 4, 32>}]} {
    %c0 = arith.constant 0 : index
    %c0_0 = arith.constant 0 : index
    %c0_1 = arith.constant 0 : index
    %0 = vector.load %arg1[%c0, %c0_0, %c0_1] : memref<1x4x37xf32, #tpu.memory_space<vmem>>, vector<1x4x37xf32>
    %c0_2 = arith.constant 0 : index
    %c0_3 = arith.constant 0 : index
    %c0_4 = arith.constant 0 : index
    %1 = vector.load %arg2[%c0_2, %c0_3, %c0_4] : memref<1x4x37xf32, #tpu.memory_space<vmem>>, vector<1x4x37xf32>
    %2 = vector.extract_strided_slice %0 {offsets = [0, 0, 5], sizes = [1, 4, 32], strides = [1, 1, 1]} : vector<1x4x37xf32> to vector<1x4x32xf32>
    %3 = vector.extract_strided_slice %1 {offsets = [0, 0, 5], sizes = [1, 4, 32], strides = [1, 1, 1]} : vector<1x4x37xf32> to vector<1x4x32xf32>
    %cst = arith.constant 0.111540742 : f32
    %4 = vector.broadcast %cst : f32 to vector<1x4x32xf32>
    %5 = arith.mulf %2, %4 : vector<1x4x32xf32>
    %cst_5 = arith.constant -0.0010773011 : f32
    %6 = vector.broadcast %cst_5 : f32 to vector<1x4x32xf32>
    %7 = arith.mulf %3, %6 : vector<1x4x32xf32>
    %8 = arith.addf %5, %7 : vector<1x4x32xf32>
    %cst_6 = arith.constant 0.494623899 : f32
    %9 = vector.broadcast %cst_6 : f32 to vector<1x4x32xf32>
    %10 = arith.mulf %2, %9 : vector<1x4x32xf32>
    %cst_7 = arith.constant -0.00477725733 : f32
    %11 = vector.broadcast %cst_7 : f32 to vector<1x4x32xf32>
    %12 = arith.mulf %3, %11 : vector<1x4x32xf32>
    %13 = arith.addf %10, %12 : vector<1x4x32xf32>
    %14 = vector.extract_strided_slice %0 {offsets = [0, 0, 4], sizes = [1, 4, 32], strides = [1, 1, 1]} : vector<1x4x37xf32> to vector<1x4x32xf32>
    %15 = vector.extract_strided_slice %1 {offsets = [0, 0, 4], sizes = [1, 4, 32], strides = [1, 1, 1]} : vector<1x4x37xf32> to vector<1x4x32xf32>
    %cst_8 = arith.constant 0.751133918 : f32
    %16 = vector.broadcast %cst_8 : f32 to vector<1x4x32xf32>
    %17 = arith.mulf %14, %16 : vector<1x4x32xf32>
    %18 = arith.addf %8, %17 : vector<1x4x32xf32>
    %cst_9 = arith.constant 5.53842227E-4 : f32
    %19 = vector.broadcast %cst_9 : f32 to vector<1x4x32xf32>
    %20 = arith.mulf %15, %19 : vector<1x4x32xf32>
    %21 = arith.addf %18, %20 : vector<1x4x32xf32>
    %cst_10 = arith.constant 0.315250337 : f32
    %22 = vector.broadcast %cst_10 : f32 to vector<1x4x32xf32>
    %23 = arith.mulf %14, %22 : vector<1x4x32xf32>
    %24 = arith.addf %13, %23 : vector<1x4x32xf32>
    %cst_11 = arith.constant 0.0315820388 : f32
    %25 = vector.broadcast %cst_11 : f32 to vector<1x4x32xf32>
    %26 = arith.mulf %15, %25 : vector<1x4x32xf32>
    %27 = arith.addf %24, %26 : vector<1x4x32xf32>
    %28 = vector.extract_strided_slice %0 {offsets = [0, 0, 3], sizes = [1, 4, 32], strides = [1, 1, 1]} : vector<1x4x37xf32> to vector<1x4x32xf32>
    %29 = vector.extract_strided_slice %1 {offsets = [0, 0, 3], sizes = [1, 4, 32], strides = [1, 1, 1]} : vector<1x4x37xf32> to vector<1x4x32xf32>
    %cst_12 = arith.constant -0.2262647 : f32
    %30 = vector.broadcast %cst_12 : f32 to vector<1x4x32xf32>
    %31 = arith.mulf %28, %30 : vector<1x4x32xf32>
    %32 = arith.addf %21, %31 : vector<1x4x32xf32>
    %cst_13 = arith.constant 0.0275228657 : f32
    %33 = vector.broadcast %cst_13 : f32 to vector<1x4x32xf32>
    %34 = arith.mulf %29, %33 : vector<1x4x32xf32>
    %35 = arith.addf %32, %34 : vector<1x4x32xf32>
    %cst_14 = arith.constant -0.129766867 : f32
    %36 = vector.broadcast %cst_14 : f32 to vector<1x4x32xf32>
    %37 = arith.mulf %28, %36 : vector<1x4x32xf32>
    %38 = arith.addf %27, %37 : vector<1x4x32xf32>
    %cst_15 = arith.constant -0.0975016057 : f32
    %39 = vector.broadcast %cst_15 : f32 to vector<1x4x32xf32>
    %40 = arith.mulf %29, %39 : vector<1x4x32xf32>
    %41 = arith.addf %38, %40 : vector<1x4x32xf32>
    %42 = vector.extract_strided_slice %0 {offsets = [0, 0, 2], sizes = [1, 4, 32], strides = [1, 1, 1]} : vector<1x4x37xf32> to vector<1x4x32xf32>
    %43 = vector.extract_strided_slice %1 {offsets = [0, 0, 2], sizes = [1, 4, 32], strides = [1, 1, 1]} : vector<1x4x37xf32> to vector<1x4x32xf32>
    %cst_16 = arith.constant 0.0975016057 : f32
    %44 = vector.broadcast %cst_16 : f32 to vector<1x4x32xf32>
    %45 = arith.mulf %42, %44 : vector<1x4x32xf32>
    %46 = arith.addf %35, %45 : vector<1x4x32xf32>
    %cst_17 = arith.constant -0.129766867 : f32
    %47 = vector.broadcast %cst_17 : f32 to vector<1x4x32xf32>
    %48 = arith.mulf %43, %47 : vector<1x4x32xf32>
    %49 = arith.addf %46, %48 : vector<1x4x32xf32>
    %cst_18 = arith.constant 0.0275228657 : f32
    %50 = vector.broadcast %cst_18 : f32 to vector<1x4x32xf32>
    %51 = arith.mulf %42, %50 : vector<1x4x32xf32>
    %52 = arith.addf %41, %51 : vector<1x4x32xf32>
    %cst_19 = arith.constant 0.2262647 : f32
    %53 = vector.broadcast %cst_19 : f32 to vector<1x4x32xf32>
    %54 = arith.mulf %43, %53 : vector<1x4x32xf32>
    %55 = arith.addf %52, %54 : vector<1x4x32xf32>
    %56 = vector.extract_strided_slice %0 {offsets = [0, 0, 1], sizes = [1, 4, 32], strides = [1, 1, 1]} : vector<1x4x37xf32> to vector<1x4x32xf32>
    %57 = vector.extract_strided_slice %1 {offsets = [0, 0, 1], sizes = [1, 4, 32], strides = [1, 1, 1]} : vector<1x4x37xf32> to vector<1x4x32xf32>
    %cst_20 = arith.constant -0.0315820388 : f32
    %58 = vector.broadcast %cst_20 : f32 to vector<1x4x32xf32>
    %59 = arith.mulf %56, %58 : vector<1x4x32xf32>
    %60 = arith.addf %49, %59 : vector<1x4x32xf32>
    %cst_21 = arith.constant 0.315250337 : f32
    %61 = vector.broadcast %cst_21 : f32 to vector<1x4x32xf32>
    %62 = arith.mulf %57, %61 : vector<1x4x32xf32>
    %63 = arith.addf %60, %62 : vector<1x4x32xf32>
    %cst_22 = arith.constant 5.53842227E-4 : f32
    %64 = vector.broadcast %cst_22 : f32 to vector<1x4x32xf32>
    %65 = arith.mulf %56, %64 : vector<1x4x32xf32>
    %66 = arith.addf %55, %65 : vector<1x4x32xf32>
    %cst_23 = arith.constant -0.751133918 : f32
    %67 = vector.broadcast %cst_23 : f32 to vector<1x4x32xf32>
    %68 = arith.mulf %57, %67 : vector<1x4x32xf32>
    %69 = arith.addf %66, %68 : vector<1x4x32xf32>
    %70 = vector.extract_strided_slice %0 {offsets = [0, 0, 0], sizes = [1, 4, 32], strides = [1, 1, 1]} : vector<1x4x37xf32> to vector<1x4x32xf32>
    %71 = vector.extract_strided_slice %1 {offsets = [0, 0, 0], sizes = [1, 4, 32], strides = [1, 1, 1]} : vector<1x4x37xf32> to vector<1x4x32xf32>
    %cst_24 = arith.constant 0.00477725733 : f32
    %72 = vector.broadcast %cst_24 : f32 to vector<1x4x32xf32>
    %73 = arith.mulf %70, %72 : vector<1x4x32xf32>
    %74 = arith.addf %63, %73 : vector<1x4x32xf32>
    %cst_25 = arith.constant 0.494623899 : f32
    %75 = vector.broadcast %cst_25 : f32 to vector<1x4x32xf32>
    %76 = arith.mulf %71, %75 : vector<1x4x32xf32>
    %77 = arith.addf %74, %76 : vector<1x4x32xf32>
    %cst_26 = arith.constant -0.0010773011 : f32
    %78 = vector.broadcast %cst_26 : f32 to vector<1x4x32xf32>
    %79 = arith.mulf %70, %78 : vector<1x4x32xf32>
    %80 = arith.addf %69, %79 : vector<1x4x32xf32>
    %cst_27 = arith.constant -0.111540742 : f32
    %81 = vector.broadcast %cst_27 : f32 to vector<1x4x32xf32>
    %82 = arith.mulf %71, %81 : vector<1x4x32xf32>
    %83 = arith.addf %80, %82 : vector<1x4x32xf32>
    %c0_28 = arith.constant 0 : index
    %c0_29 = arith.constant 0 : index
    %c0_30 = arith.constant 0 : index
    %84 = vector.load %arg3[%c0_28, %c0_29, %c0_30] : memref<1x4x32xf32, #tpu.memory_space<vmem>>, vector<1x4x32xf32>
    tpu.vector_store %arg3[%c0_28, %c0_29, %c0_30], %77 {strides = array<i32>} : memref<1x4x32xf32, #tpu.memory_space<vmem>>, vector<1x4x32xf32>,
    %c0_31 = arith.constant 0 : index
    %c0_32 = arith.constant 0 : index
    %c0_33 = arith.constant 0 : index
    %85 = vector.load %arg4[%c0_31, %c0_32, %c0_33] : memref<1x4x32xf32, #tpu.memory_space<vmem>>, vector<1x4x32xf32>
    tpu.vector_store %arg4[%c0_31, %c0_32, %c0_33], %83 {strides = array<i32>} : memref<1x4x32xf32, #tpu.memory_space<vmem>>, vector<1x4x32xf32>,
    return
  }
  func.func @transform_0(%arg0: i32) -> (i32, i32, i32) {
    %c0_i32 = arith.constant 0 : i32
    %c0_i32_0 = arith.constant 0 : i32
    %c0_i32_1 = arith.constant 0 : i32
    return %arg0, %c0_i32, %c0_i32_0 : i32, i32, i32
  }
  func.func @transform_1(%arg0: i32) -> (i32, i32, i32) {
    %c0_i32 = arith.constant 0 : i32
    %c0_i32_0 = arith.constant 0 : i32
    %c0_i32_1 = arith.constant 0 : i32
    return %arg0, %c0_i32, %c0_i32_0 : i32, i32, i32
  }
  func.func @transform_2(%arg0: i32) -> (i32, i32, i32) {
    %c0_i32 = arith.constant 0 : i32
    %c0_i32_0 = arith.constant 0 : i32
    %c0_i32_1 = arith.constant 0 : i32
    return %arg0, %c0_i32, %c0_i32_0 : i32, i32, i32
  }
  func.func @transform_3(%arg0: i32) -> (i32, i32, i32) {
    %c0_i32 = arith.constant 0 : i32
    %c0_i32_0 = arith.constant 0 : i32
    %c0_i32_1 = arith.constant 0 : i32
    return %arg0, %c0_i32, %c0_i32_0 : i32, i32, i32
  }
}

</mosaic_0001>

<bundles_post_ra>
// kernel: wave_conv1d_forward.6
= control target key start
LH: loop header
LB: loop body
LE: loop exit
PB: predicated region body
PF: predicated region fallthrough
CT: control target
= control target key end

     0   :  { %s478_s12 = smov 0   ;;  %s507_s0 = inlined_call_operand.vmem [shape: f32[2,4,42], index: 0, kind: input, shape index: {}]   ;;  %s508_s1 = inlined_call_operand.vmem [shape: f32[2,4,42], index: 1, kind: input, shape index: {}]   ;;  %s509_s2 = inlined_call_operand.vmem [shape: f32[2,4,37], index: 2, kind: output, shape index: {0}]   ;;  %s510_s3 = inlined_call_operand.vmem [shape: f32[2,4,37], index: 3, kind: output, shape index: {1}]  }
   0x1 LB: > { %s421_s13 = sadd.s32 4294967295, %s451_s12   ;;  %p425_p0 = scmp.ge.s32.totalorder %s451_s12, 1  ;;  %s451_s12 = sphi %s478_s12, %s14_s12  }
   0x2   : > { %p148_p1 = scmp.lt.s32.totalorder %s451_s12, 3 }
   0x4   : > { %p149_p2 = pnand %p425_p0, %p148_p1 }
   0x5   : > { %p178_p3 = scmp.lt.s32.totalorder (!%p149_p2), %s421_s13, 1  ;;  %s453_s21 = smov (!%p149_p2), 127  }
   0x6   : > { %152 = sbr.rel (%p149_p2) target bundleno = 172 (0xac), region = 28  ;;  %s454_s22 = smov (!%p149_p2), 126  }
   0x7   : > { %s455_s23 = smov (!%p149_p2), 125   ;;  %s456_s24 = smov (!%p149_p2), 124  }
   0x8   : > { %s457_s25 = smov (!%p149_p2), 123  }
   0xb   : > { %s512_s13 = smov (!%p178_p3, %s421_s13), 1  ;;  %vm322_vm0 = vcmask 297984  }
   0xc   : > { %s486_s14 = sshll.u32 %s512_s13, 2 }
   0xd   : > { %s185_s17 = scalar_lea.vmem %s508_s1, %s486_s14  ;;  %s181_s20 = scalar_lea.vmem %s507_s0, %s486_s14 }
   0xe   : > { %v195_v0 = vld [vmem:[%s185_s17] sm:$0xf]  ;;  %s193_s28 = scalar_lea.vmem %s510_s3, %s486_s14  ;;  %s189_s4 = scalar_lea.vmem %s509_s2, %s486_s14 }
   0xf   : > { %v194_v1 = vld [vmem:[%s181_s20] sm:$0xf]  ;;  %v208_v2 = vmul.f32 0.31525034, %v195_v0  ;;  %v220_v4 = vmul.f32 0.03158204, %v195_v0 }
  0x10   : > { %v202_v3 = vmul.f32 0.7511339, %v194_v1  ;;  %v214_v5 = vmul.f32 0.0005538422, %v194_v1  ;;  %v238_v6 = vmul.f32 0.027522866, %v194_v1 }
  0x11   : > { %210 = vrot.lane.b32.xlu1 %v208_v2, %s453_s21  ;;  %v226_v7 = vmul.f32 -0.2262647, %v194_v1  ;;  %v197_v8 = vmul.f32 0.4946239, %v195_v0  ;;  %v196_v9 = vmul.f32 0.11154074, %v194_v1 }
  0x12   : > { %204 = vrot.lane.b32.xlu0 %v202_v3, %s453_s21  ;;  %v200_v10 = vmul.f32 -0.0047772573, %v195_v0  ;;  %v199_v11 = vmul.f32 -0.0010773011, %v194_v1  ;;  %v244_v14 = vmul.f32 -0.097501606, %v195_v0 }
  0x13   : > { %v198_v12 = vadd.f32 %v197_v8, %v196_v9  ;;  %v232_v15 = vmul.f32 -0.12976687, %v195_v0  ;;  %v262_v16 = vmul.f32 -0.12976687, %v194_v1  ;;  %v250_v17 = vmul.f32 0.097501606, %v194_v1 }
  0x14   : > { %v201_v13 = vadd.f32 %v200_v10, %v199_v11  ;;  %v268_v18 = vmul.f32 0.2262647, %v195_v0  ;;  %v256_v19 = vmul.f32 0.027522866, %v195_v0  ;;  %v286_v20 = vmul.f32 0.31525034, %v194_v1 }
  0x15   : > { %222 = vrot.lane.b32.xlu1 %v220_v4, %s453_s21  ;;  %v274_v21 = vmul.f32 -0.03158204, %v194_v1  ;;  %v292_v22 = vmul.f32 -0.7511339, %v195_v0  ;;  %v280_v23 = vmul.f32 0.0005538422, %v195_v0 }
  0x16   : > { %216 = vrot.lane.b32.xlu0 %v214_v5, %s453_s21  ;;  %v310_v24 = vmul.f32 0.4946239, %v194_v1  ;;  %v298_v25 = vmul.f32 0.0047772573, %v194_v1  ;;  %v316_v26 = vmul.f32 -0.11154074, %v195_v0 }
  0x17   : > { %v304_v27 = vmul.f32 -0.0010773011, %v195_v0 }
  0x19   : > { %240 = vrot.lane.b32.xlu1 %v238_v6, %s454_s22 }
  0x1a   : > { %228 = vrot.lane.b32.xlu0 %v226_v7, %s454_s22 }
  0x1d   : > { %246 = vrot.lane.b32.xlu1 %v244_v14, %s454_s22 }
  0x1e   : > { %234 = vrot.lane.b32.xlu0 %v232_v15, %s454_s22 }
  0x21   : > { %264 = vrot.lane.b32.xlu1 %v262_v16, %s455_s23 }
  0x22   : > { %252 = vrot.lane.b32.xlu0 %v250_v17, %s455_s23 }
  0x25   : > { %270 = vrot.lane.b32.xlu1 %v268_v18, %s455_s23 }
  0x26   : > { %258 = vrot.lane.b32.xlu0 %v256_v19, %s455_s23 }
  0x29   : > { %288 = vrot.lane.b32.xlu1 %v286_v20, %s456_s24 }
  0x2a   : > { %276 = vrot.lane.b32.xlu0 %v274_v21, %s456_s24 }
  0x2d   : > { %294 = vrot.lane.b32.xlu1 %v292_v22, %s456_s24 }
  0x2e   : > { %282 = vrot.lane.b32.xlu0 %v280_v23, %s456_s24 }
  0x31   : > { %312 = vrot.lane.b32.xlu1 %v310_v24, %s457_s25 }
  0x32   : > { %300 = vrot.lane.b32.xlu0 %v298_v25, %s457_s25 }
  0x35   : > { %318 = vrot.lane.b32.xlu1 %v316_v26, %s457_s25 }
  0x36   : > { %306 = vrot.lane.b32.xlu0 %v304_v27, %s457_s25 }
  0x83   : > { %v211_v28 = vpop.permute.xlu1 %210 }
  0x84   : > { %v205_v29 = vpop.permute.xlu0 %204 }
  0x85   : > { %v207_v39 = vadd.f32 %v205_v29, %v198_v12 }
  0x87   : > { %v223_v30 = vpop.permute.xlu1 %222  ;;  %v213_v43 = vadd.f32 %v211_v28, %v207_v39 }
  0x88   : > { %v217_v31 = vpop.permute.xlu0 %216 }
  0x89   : > { %v219_v36 = vadd.f32 %v217_v31, %v201_v13 }
  0x8b   : > { %v241_v32 = vpop.permute.xlu1 %240  ;;  %v225_v40 = vadd.f32 %v223_v30, %v219_v36 }
  0x8c   : > { %v229_v33 = vpop.permute.xlu0 %228 }
  0x8d   : > { %v243_v44 = vadd.f32 %v241_v32, %v225_v40  ;;  %v231_v45 = vadd.f32 %v229_v33, %v213_v43 }
  0x8f   : > { %v247_v34 = vpop.permute.xlu1 %246 }
  0x90   : > { %v235_v35 = vpop.permute.xlu0 %234  ;;  %v249_v48 = vadd.f32 %v247_v34, %v243_v44 }
  0x91   : > { %v237_v49 = vadd.f32 %v235_v35, %v231_v45 }
  0x93   : > { %v265_v37 = vpop.permute.xlu1 %264 }
  0x94   : > { %v253_v38 = vpop.permute.xlu0 %252  ;;  %v267_v50 = vadd.f32 %v265_v37, %v249_v48 }
  0x95   : > { %v255_v51 = vadd.f32 %v253_v38, %v237_v49 }
  0x97   : > { %v271_v41 = vpop.permute.xlu1 %270 }
  0x98   : > { %v259_v42 = vpop.permute.xlu0 %258  ;;  %v273_v54 = vadd.f32 %v271_v41, %v267_v50 }
  0x99   : > { %v261_v55 = vadd.f32 %v259_v42, %v255_v51 }
  0x9b   : > { %v289_v46 = vpop.permute.xlu1 %288 }
  0x9c   : > { %v277_v47 = vpop.permute.xlu0 %276  ;;  %v291_v56 = vadd.f32 %v289_v46, %v273_v54 }
  0x9d   : > { %v279_v57 = vadd.f32 %v277_v47, %v261_v55 }
  0x9f   : > { %v295_v52 = vpop.permute.xlu1 %294 }
  0xa0   : > { %v283_v53 = vpop.permute.xlu0 %282  ;;  %v297_v60 = vadd.f32 %v295_v52, %v291_v56 }
  0xa1   : > { %v285_v61 = vadd.f32 %v283_v53, %v279_v57 }
  0xa3   : > { %v313_v58 = vpop.permute.xlu1 %312 }
  0xa4   : > { %v301_v59 = vpop.permute.xlu0 %300  ;;  %v315_v62 = vadd.f32 %v313_v58, %v297_v60 }
  0xa5   : > { %v303_v63 = vadd.f32 %v301_v59, %v285_v61 }
  0xa7   : > { %v319_v0 = vpop.permute.xlu1 %318 }
  0xa8   : > { %v307_v1 = vpop.permute.xlu0 %306  ;;  %v321_v2 = vadd.f32 %v319_v0, %v315_v62 }
  0xa9   : > { %v309_v3 = vadd.f32 %v307_v1, %v303_v63 }
  0xaa   : > { %324 = vst.msk [vmem:[%s193_s28] sm:$0xf] %vm322_vm0, %v321_v2 }
  0xab   : > { %323 = vst.msk [vmem:[%s189_s4] sm:$0xf] %vm322_vm0, %v309_v3 }
  0xac PF: > { %s14_s12 = sadd.s32 1, %s451_s12  }
  0xad   : > { %p11_p4 = scmp.ge.s32.totalorder %s14_s12, 4  }
  0xaf   :  { %13 = sbr.rel (!%p11_p4) target bundleno = 1 (0x1), region = 73 }

// kernel: wave_conv1d_forward.7
= control target key start
LH: loop header
LB: loop body
LE: loop exit
PB: predicated region body
PF: predicated region fallthrough
CT: control target
= control target key end

     0   :  { %s478_s12 = smov 0   ;;  %s507_s0 = inlined_call_operand.vmem [shape: f32[2,4,29], index: 0, kind: input, shape index: {}]   ;;  %s508_s1 = inlined_call_operand.vmem [shape: f32[2,4,29], index: 1, kind: input, shape index: {}]   ;;  %s509_s2 = inlined_call_operand.vmem [shape: f32[2,4,24], index: 2, kind: output, shape index: {0}]   ;;  %s510_s3 = inlined_call_operand.vmem [shape: f32[2,4,24], index: 3, kind: output, shape index: {1}]  }
   0x1 LB: > { %s421_s13 = sadd.s32 4294967295, %s451_s12   ;;  %p425_p0 = scmp.ge.s32.totalorder %s451_s12, 1  ;;  %s451_s12 = sphi %s478_s12, %s14_s12  }
   0x2   : > { %p148_p1 = scmp.lt.s32.totalorder %s451_s12, 3 }
   0x4   : > { %p149_p2 = pnand %p425_p0, %p148_p1 }
   0x5   : > { %p178_p3 = scmp.lt.s32.totalorder (!%p149_p2), %s421_s13, 1  ;;  %s453_s21 = smov (!%p149_p2), 127  }
   0x6   : > { %152 = sbr.rel (%p149_p2) target bundleno = 172 (0xac), region = 28  ;;  %s454_s22 = smov (!%p149_p2), 126  }
   0x7   : > { %s455_s23 = smov (!%p149_p2), 125   ;;  %s456_s24 = smov (!%p149_p2), 124  }
   0x8   : > { %s457_s25 = smov (!%p149_p2), 123  }
   0xb   : > { %s512_s13 = smov (!%p178_p3, %s421_s13), 1  ;;  %vm322_vm0 = vcmask 191488  }
   0xc   : > { %s486_s14 = sshll.u32 %s512_s13, 2 }
   0xd   : > { %s185_s17 = scalar_lea.vmem %s508_s1, %s486_s14  ;;  %s181_s20 = scalar_lea.vmem %s507_s0, %s486_s14 }
   0xe   : > { %v195_v0 = vld [vmem:[%s185_s17] sm:$0xf]  ;;  %s193_s28 = scalar_lea.vmem %s510_s3, %s486_s14  ;;  %s189_s4 = scalar_lea.vmem %s509_s2, %s486_s14 }
   0xf   : > { %v194_v1 = vld [vmem:[%s181_s20] sm:$0xf]  ;;  %v208_v2 = vmul.f32 0.31525034, %v195_v0  ;;  %v220_v4 = vmul.f32 0.03158204, %v195_v0 }
  0x10   : > { %v202_v3 = vmul.f32 0.7511339, %v194_v1  ;;  %v214_v5 = vmul.f32 0.0005538422, %v194_v1  ;;  %v238_v6 = vmul.f32 0.027522866, %v194_v1 }
  0x11   : > { %210 = vrot.lane.b32.xlu1 %v208_v2, %s453_s21  ;;  %v226_v7 = vmul.f32 -0.2262647, %v194_v1  ;;  %v197_v8 = vmul.f32 0.4946239, %v195_v0  ;;  %v196_v9 = vmul.f32 0.11154074, %v194_v1 }
  0x12   : > { %204 = vrot.lane.b32.xlu0 %v202_v3, %s453_s21  ;;  %v200_v10 = vmul.f32 -0.0047772573, %v195_v0  ;;  %v199_v11 = vmul.f32 -0.0010773011, %v194_v1  ;;  %v244_v14 = vmul.f32 -0.097501606, %v195_v0 }
  0x13   : > { %v198_v12 = vadd.f32 %v197_v8, %v196_v9  ;;  %v232_v15 = vmul.f32 -0.12976687, %v195_v0  ;;  %v262_v16 = vmul.f32 -0.12976687, %v194_v1  ;;  %v250_v17 = vmul.f32 0.097501606, %v194_v1 }
  0x14   : > { %v201_v13 = vadd.f32 %v200_v10, %v199_v11  ;;  %v268_v18 = vmul.f32 0.2262647, %v195_v0  ;;  %v256_v19 = vmul.f32 0.027522866, %v195_v0  ;;  %v286_v20 = vmul.f32 0.31525034, %v194_v1 }
  0x15   : > { %222 = vrot.lane.b32.xlu1 %v220_v4, %s453_s21  ;;  %v274_v21 = vmul.f32 -0.03158204, %v194_v1  ;;  %v292_v22 = vmul.f32 -0.7511339, %v195_v0  ;;  %v280_v23 = vmul.f32 0.0005538422, %v195_v0 }
  0x16   : > { %216 = vrot.lane.b32.xlu0 %v214_v5, %s453_s21  ;;  %v310_v24 = vmul.f32 0.4946239, %v194_v1  ;;  %v298_v25 = vmul.f32 0.0047772573, %v194_v1  ;;  %v316_v26 = vmul.f32 -0.11154074, %v195_v0 }
  0x17   : > { %v304_v27 = vmul.f32 -0.0010773011, %v195_v0 }
  0x19   : > { %240 = vrot.lane.b32.xlu1 %v238_v6, %s454_s22 }
  0x1a   : > { %228 = vrot.lane.b32.xlu0 %v226_v7, %s454_s22 }
  0x1d   : > { %246 = vrot.lane.b32.xlu1 %v244_v14, %s454_s22 }
  0x1e   : > { %234 = vrot.lane.b32.xlu0 %v232_v15, %s454_s22 }
  0x21   : > { %264 = vrot.lane.b32.xlu1 %v262_v16, %s455_s23 }
  0x22   : > { %252 = vrot.lane.b32.xlu0 %v250_v17, %s455_s23 }
  0x25   : > { %270 = vrot.lane.b32.xlu1 %v268_v18, %s455_s23 }
  0x26   : > { %258 = vrot.lane.b32.xlu0 %v256_v19, %s455_s23 }
  0x29   : > { %288 = vrot.lane.b32.xlu1 %v286_v20, %s456_s24 }
  0x2a   : > { %276 = vrot.lane.b32.xlu0 %v274_v21, %s456_s24 }
  0x2d   : > { %294 = vrot.lane.b32.xlu1 %v292_v22, %s456_s24 }
  0x2e   : > { %282 = vrot.lane.b32.xlu0 %v280_v23, %s456_s24 }
  0x31   : > { %312 = vrot.lane.b32.xlu1 %v310_v24, %s457_s25 }
  0x32   : > { %300 = vrot.lane.b32.xlu0 %v298_v25, %s457_s25 }
  0x35   : > { %318 = vrot.lane.b32.xlu1 %v316_v26, %s457_s25 }
  0x36   : > { %306 = vrot.lane.b32.xlu0 %v304_v27, %s457_s25 }
  0x83   : > { %v211_v28 = vpop.permute.xlu1 %210 }
  0x84   : > { %v205_v29 = vpop.permute.xlu0 %204 }
  0x85   : > { %v207_v39 = vadd.f32 %v205_v29, %v198_v12 }
  0x87   : > { %v223_v30 = vpop.permute.xlu1 %222  ;;  %v213_v43 = vadd.f32 %v211_v28, %v207_v39 }
  0x88   : > { %v217_v31 = vpop.permute.xlu0 %216 }
  0x89   : > { %v219_v36 = vadd.f32 %v217_v31, %v201_v13 }
  0x8b   : > { %v241_v32 = vpop.permute.xlu1 %240  ;;  %v225_v40 = vadd.f32 %v223_v30, %v219_v36 }
  0x8c   : > { %v229_v33 = vpop.permute.xlu0 %228 }
  0x8d   : > { %v243_v44 = vadd.f32 %v241_v32, %v225_v40  ;;  %v231_v45 = vadd.f32 %v229_v33, %v213_v43 }
  0x8f   : > { %v247_v34 = vpop.permute.xlu1 %246 }
  0x90   : > { %v235_v35 = vpop.permute.xlu0 %234  ;;  %v249_v48 = vadd.f32 %v247_v34, %v243_v44 }
  0x91   : > { %v237_v49 = vadd.f32 %v235_v35, %v231_v45 }
  0x93   : > { %v265_v37 = vpop.permute.xlu1 %264 }
  0x94   : > { %v253_v38 = vpop.permute.xlu0 %252  ;;  %v267_v50 = vadd.f32 %v265_v37, %v249_v48 }
  0x95   : > { %v255_v51 = vadd.f32 %v253_v38, %v237_v49 }
  0x97   : > { %v271_v41 = vpop.permute.xlu1 %270 }
  0x98   : > { %v259_v42 = vpop.permute.xlu0 %258  ;;  %v273_v54 = vadd.f32 %v271_v41, %v267_v50 }
  0x99   : > { %v261_v55 = vadd.f32 %v259_v42, %v255_v51 }
  0x9b   : > { %v289_v46 = vpop.permute.xlu1 %288 }
  0x9c   : > { %v277_v47 = vpop.permute.xlu0 %276  ;;  %v291_v56 = vadd.f32 %v289_v46, %v273_v54 }
  0x9d   : > { %v279_v57 = vadd.f32 %v277_v47, %v261_v55 }
  0x9f   : > { %v295_v52 = vpop.permute.xlu1 %294 }
  0xa0   : > { %v283_v53 = vpop.permute.xlu0 %282  ;;  %v297_v60 = vadd.f32 %v295_v52, %v291_v56 }
  0xa1   : > { %v285_v61 = vadd.f32 %v283_v53, %v279_v57 }
  0xa3   : > { %v313_v58 = vpop.permute.xlu1 %312 }
  0xa4   : > { %v301_v59 = vpop.permute.xlu0 %300  ;;  %v315_v62 = vadd.f32 %v313_v58, %v297_v60 }
  0xa5   : > { %v303_v63 = vadd.f32 %v301_v59, %v285_v61 }
  0xa7   : > { %v319_v0 = vpop.permute.xlu1 %318 }
  0xa8   : > { %v307_v1 = vpop.permute.xlu0 %306  ;;  %v321_v2 = vadd.f32 %v319_v0, %v315_v62 }
  0xa9   : > { %v309_v3 = vadd.f32 %v307_v1, %v303_v63 }
  0xaa   : > { %324 = vst.msk [vmem:[%s193_s28] sm:$0xf] %vm322_vm0, %v321_v2 }
  0xab   : > { %323 = vst.msk [vmem:[%s189_s4] sm:$0xf] %vm322_vm0, %v309_v3 }
  0xac PF: > { %s14_s12 = sadd.s32 1, %s451_s12  }
  0xad   : > { %p11_p4 = scmp.ge.s32.totalorder %s14_s12, 4  }
  0xaf   :  { %13 = sbr.rel (!%p11_p4) target bundleno = 1 (0x1), region = 73 }

// kernel: wave_conv1d_forward.10
= control target key start
LH: loop header
LB: loop body
LE: loop exit
PB: predicated region body
PF: predicated region fallthrough
CT: control target
= control target key end

     0   :  { %s488_s12 = smov 0   ;;  %s517_s0 = inlined_call_operand.vmem [shape: f32[2,4,24], index: 0, kind: input, shape index: {}]   ;;  %s518_s1 = inlined_call_operand.vmem [shape: f32[2,4,24], index: 1, kind: input, shape index: {}]   ;;  %s519_s2 = inlined_call_operand.vmem [shape: f32[2,4,19], index: 2, kind: output, shape index: {0}]   ;;  %s520_s3 = inlined_call_operand.vmem [shape: f32[2,4,19], index: 3, kind: output, shape index: {1}]  }
   0x1 LB: > { %s429_s13 = sadd.s32 4294967295, %s460_s12   ;;  %p433_p0 = scmp.ge.s32.totalorder %s460_s12, 1  ;;  %s460_s12 = sphi %s488_s12, %s14_s12  }
   0x2   : > { %p148_p1 = scmp.lt.s32.totalorder %s460_s12, 3 }
   0x4   : > { %p149_p2 = pnand %p433_p0, %p148_p1 }
   0x5   : > { %p178_p3 = scmp.lt.s32.totalorder (!%p149_p2), %s429_s13, 1  ;;  %s462_s21 = smov (!%p149_p2), 1  }
   0x6   : > { %152 = sbr.rel (%p149_p2) target bundleno = 287 (0x11f), region = 28  ;;  %s463_s22 = smov (!%p149_p2), 2  }
   0x7   : > { %s464_s23 = smov (!%p149_p2), 3   ;;  %s465_s24 = smov (!%p149_p2), 4  }
   0x8   : > { %s466_s25 = smov (!%p149_p2), 5   ;;  %s467_s26 = smov (!%p149_p2), 123  }
   0xb   : > { %s522_s13 = smov (!%p178_p3, %s429_s13), 1  ;;  %vm326_vm0 = vcmask 150528  }
   0xc   : > { %s496_s14 = sshll.u32 %s522_s13, 2 }
   0xd   : > { %s185_s17 = scalar_lea.vmem %s518_s1, %s496_s14  ;;  %s181_s20 = scalar_lea.vmem %s517_s0, %s496_s14 }
   0xe   : > { %v195_v0 = vld [vmem:[%s185_s17] sm:$0xf]  ;;  %s193_s29 = scalar_lea.vmem %s520_s3, %s496_s14  ;;  %s189_s5 = scalar_lea.vmem %s519_s2, %s496_s14 }
   0xf   : > { %v194_v1 = vld [vmem:[%s181_s20] sm:$0xf]  ;;  %v208_v2 = vmul.f32 0.0005538422, %v195_v0  ;;  %v220_v4 = vmul.f32 0.03158204, %v195_v0 }
  0x10   : > { %v202_v3 = vmul.f32 0.7511339, %v194_v1  ;;  %v214_v5 = vmul.f32 0.31525034, %v194_v1  ;;  %v238_v6 = vmul.f32 -0.12976687, %v194_v1 }
  0x11   : > { %210 = vrot.lane.b32.xlu1 %v208_v2, %s462_s21  ;;  %v226_v7 = vmul.f32 -0.2262647, %v194_v1  ;;  %v197_v8 = vmul.f32 -0.0010773011, %v195_v0  ;;  %v196_v9 = vmul.f32 0.11154074, %v194_v1 }
  0x12   : > { %204 = vrot.lane.b32.xlu0 %v202_v3, %s462_s21  ;;  %v200_v10 = vmul.f32 -0.0047772573, %v195_v0  ;;  %v199_v11 = vmul.f32 0.4946239, %v194_v1  ;;  %v244_v14 = vmul.f32 -0.097501606, %v195_v0 }
  0x13   : > { %v198_v12 = vadd.f32 %v197_v8, %v196_v9  ;;  %v232_v15 = vmul.f32 0.027522866, %v195_v0  ;;  %v262_v16 = vmul.f32 0.027522866, %v194_v1  ;;  %v250_v17 = vmul.f32 0.097501606, %v194_v1 }
  0x14   : > { %v201_v13 = vadd.f32 %v200_v10, %v199_v11  ;;  %v268_v18 = vmul.f32 0.2262647, %v195_v0  ;;  %v256_v19 = vmul.f32 -0.12976687, %v195_v0  ;;  %v286_v20 = vmul.f32 0.0005538422, %v194_v1 }
  0x15   : > { %222 = vrot.lane.b32.xlu1 %v220_v4, %s462_s21  ;;  %v274_v21 = vmul.f32 -0.03158204, %v194_v1  ;;  %v292_v22 = vmul.f32 -0.7511339, %v195_v0  ;;  %v280_v23 = vmul.f32 0.31525034, %v195_v0 }
  0x16   : > { %216 = vrot.lane.b32.xlu0 %v214_v5, %s462_s21  ;;  %v310_v24 = vmul.f32 -0.0010773011, %v194_v1  ;;  %v298_v25 = vmul.f32 0.0047772573, %v194_v1  ;;  %v316_v26 = vmul.f32 -0.11154074, %v195_v0 }
  0x17   : > { %v304_v27 = vmul.f32 0.4946239, %v195_v0 }
  0x19   : > { %240 = vrot.lane.b32.xlu1 %v238_v6, %s463_s22 }
  0x1a   : > { %228 = vrot.lane.b32.xlu0 %v226_v7, %s463_s22 }
  0x1d   : > { %246 = vrot.lane.b32.xlu1 %v244_v14, %s463_s22 }
  0x1e   : > { %234 = vrot.lane.b32.xlu0 %v232_v15, %s463_s22 }
  0x21   : > { %264 = vrot.lane.b32.xlu1 %v262_v16, %s464_s23 }
  0x22   : > { %252 = vrot.lane.b32.xlu0 %v250_v17, %s464_s23 }
  0x25   : > { %270 = vrot.lane.b32.xlu1 %v268_v18, %s464_s23 }
  0x26   : > { %258 = vrot.lane.b32.xlu0 %v256_v19, %s464_s23 }
  0x29   : > { %288 = vrot.lane.b32.xlu1 %v286_v20, %s465_s24 }
  0x2a   : > { %276 = vrot.lane.b32.xlu0 %v274_v21, %s465_s24 }
  0x2d   : > { %294 = vrot.lane.b32.xlu1 %v292_v22, %s465_s24 }
  0x2e   : > { %282 = vrot.lane.b32.xlu0 %v280_v23, %s465_s24 }
  0x31   : > { %312 = vrot.lane.b32.xlu1 %v310_v24, %s466_s25 }
  0x32   : > { %300 = vrot.lane.b32.xlu0 %v298_v25, %s466_s25 }
  0x35   : > { %318 = vrot.lane.b32.xlu1 %v316_v26, %s466_s25 }
  0x36   : > { %306 = vrot.lane.b32.xlu0 %v304_v27, %s466_s25 }
  0x83   : > { %v211_v28 = vpop.permute.xlu1 %210 }
  0x84   : > { %v205_v29 = vpop.permute.xlu0 %204 }
  0x85   : > { %v207_v39 = vadd.f32 %v205_v29, %v198_v12 }
  0x87   : > { %v223_v30 = vpop.permute.xlu1 %222  ;;  %v213_v43 = vadd.f32 %v211_v28, %v207_v39 }
  0x88   : > { %v217_v31 = vpop.permute.xlu0 %216 }
  0x89   : > { %v219_v36 = vadd.f32 %v217_v31, %v201_v13 }
  0x8b   : > { %v241_v32 = vpop.permute.xlu1 %240  ;;  %v225_v40 = vadd.f32 %v223_v30, %v219_v36 }
  0x8c   : > { %v229_v33 = vpop.permute.xlu0 %228 }
  0x8d   : > { %v243_v44 = vadd.f32 %v241_v32, %v225_v40  ;;  %v231_v45 = vadd.f32 %v229_v33, %v213_v43 }
  0x8f   : > { %v247_v34 = vpop.permute.xlu1 %246 }
  0x90   : > { %v235_v35 = vpop.permute.xlu0 %234  ;;  %v249_v48 = vadd.f32 %v247_v34, %v243_v44 }
  0x91   : > { %v237_v49 = vadd.f32 %v235_v35, %v231_v45 }
  0x93   : > { %v265_v37 = vpop.permute.xlu1 %264 }
  0x94   : > { %v253_v38 = vpop.permute.xlu0 %252  ;;  %v267_v50 = vadd.f32 %v265_v37, %v249_v48 }
  0x95   : > { %v255_v51 = vadd.f32 %v253_v38, %v237_v49 }
  0x97   : > { %v271_v41 = vpop.permute.xlu1 %270 }
  0x98   : > { %v259_v42 = vpop.permute.xlu0 %258  ;;  %v273_v54 = vadd.f32 %v271_v41, %v267_v50 }
  0x99   : > { %v261_v55 = vadd.f32 %v259_v42, %v255_v51 }
  0x9b   : > { %v289_v46 = vpop.permute.xlu1 %288 }
  0x9c   : > { %v277_v47 = vpop.permute.xlu0 %276  ;;  %v291_v56 = vadd.f32 %v289_v46, %v273_v54 }
  0x9d   : > { %v279_v57 = vadd.f32 %v277_v47, %v261_v55 }
  0x9f   : > { %v295_v52 = vpop.permute.xlu1 %294 }
  0xa0   : > { %v283_v53 = vpop.permute.xlu0 %282  ;;  %v297_v60 = vadd.f32 %v295_v52, %v291_v56 }
  0xa1   : > { %v285_v61 = vadd.f32 %v283_v53, %v279_v57 }
  0xa3   : > { %v313_v58 = vpop.permute.xlu1 %312 }
  0xa4   : > { %v301_v59 = vpop.permute.xlu0 %300  ;;  %v315_v62 = vadd.f32 %v313_v58, %v297_v60 }
  0xa5   : > { %v303_v63 = vadd.f32 %v301_v59, %v285_v61 }
  0xa7   : > { %v319_v0 = vpop.permute.xlu1 %318 }
  0xa8   : > { %v307_v1 = vpop.permute.xlu0 %306  ;;  %v321_v2 = vadd.f32 %v319_v0, %v315_v62 }
  0xa9   : > { %v309_v3 = vadd.f32 %v307_v1, %v303_v63 }
  0xaa   : > { %329 = vrot.lane.b32.xlu1 %v321_v2, %s467_s26 }
  0xab   : > { %323 = vrot.lane.b32.xlu0 %v309_v3, %s467_s26 }
 0x11c   : > { %v330_v4 = vpop.permute.xlu1 %329 }
 0x11d   : > { %v324_v5 = vpop.permute.xlu0 %323  ;;  %332 = vst.msk [vmem:[%s193_s29] sm:$0xf] %vm326_vm0, %v330_v4 }
 0x11e   : > { %327 = vst.msk [vmem:[%s189_s5] sm:$0xf] %vm326_vm0, %v324_v5 }
 0x11f PF: > { %s14_s12 = sadd.s32 1, %s460_s12  }
 0x120   : > { %p11_p4 = scmp.ge.s32.totalorder %s14_s12, 4  }
 0x122   :  { %13 = sbr.rel (!%p11_p4) target bundleno = 1 (0x1), region = 73 }

// kernel: wave_conv1d_forward.8
= control target key start
LH: loop header
LB: loop body
LE: loop exit
PB: predicated region body
PF: predicated region fallthrough
CT: control target
= control target key end

     0   :  { %vm63_vm0 = vcmask 1043456   ;;  %vm59_vm1 = vcmask 31744   ;;  %v2132_v0 = vmov 0.0   ;;  %vm2133_vm2 = vmmov 0   ;;  %s2509_s1 = inlined_call_operand.vmem [shape: f32[24,4,4], index: 1, kind: input, shape index: {}]   ;;  %s2510_s0 = inlined_call_operand.vmem [shape: f32[24,2,4], index: 0, kind: input, shape index: {}]   ;;  %s2511_s2 = inlined_call_operand.vmem [shape: f32[24,2,4], index: 2, kind: output, shape index: {}]  }
   0x1   :  { %2010 = vmatprep.subr.mxu0 %v2132_v0  ;;  %2015 = vmatprep.subr.mxu1 %v2132_v0  ;;  %v35_v1 = vld [vmem:[%s2509_s1] sm:$0xf]  ;;  %v36_v2 = vld [vmem:[%s2509_s1 + $0x4] sm:$0xf]  ;;  %v37_v5 = vld [vmem:[%s2509_s1 + $0x8] sm:$0xf] }
   0x2   :  { %v11_v3 = vld [vmem:[%s2510_s0] sm:$0x3]  ;;  %2011 = vmatpush3.msk.msra.mxu0 %vm63_vm0, %v35_v1  ;;  %2012 = vmatprep.mubr.msk.f32.mxu0 %vm2133_vm2, %v2132_v0  ;;  %v12_v4 = vld [vmem:[%s2510_s0 + $0x2] sm:$0x3]  ;;  %v38_v6 = vld [vmem:[%s2509_s1 + $0xc] sm:$0xf] }
   0x3   :  { %2016 = vmatpush3.msk.msra.mxu1 %vm63_vm0, %v36_v2  ;;  %2017 = vmatprep.mubr.msk.f32.mxu1 %vm2133_vm2, %v2132_v0  ;;  %v13_v7 = vld [vmem:[%s2510_s0 + $0x4] sm:$0x3]  ;;  %v14_v8 = vld [vmem:[%s2510_s0 + $0x6] sm:$0x3]  ;;  %v39_v9 = vld [vmem:[%s2509_s1 + $0x10] sm:$0xf] }
   0x4   :  { %2013 = vmatmul.mubr.msk.f32.vlgmr.msra.gmra.mxu0 %vm59_vm1, %v11_v3  ;;  %2018 = vmatmul.mubr.msk.f32.vlgmr.msra.gmra.mxu1 %vm59_vm1, %v12_v4  ;;  %v40_v10 = vld [vmem:[%s2509_s1 + $0x14] sm:$0xf]  ;;  %v15_v11 = vld [vmem:[%s2510_s0 + $0x8] sm:$0x3]  ;;  %v16_v12 = vld [vmem:[%s2510_s0 + $0xa] sm:$0x3] }
   0x5   :  { %2020 = vmatprep.subr.mxu0 %v2132_v0  ;;  %2025 = vmatprep.subr.mxu1 %v2132_v0  ;;  %v41_v13 = vld [vmem:[%s2509_s1 + $0x18] sm:$0xf]  ;;  %v42_v14 = vld [vmem:[%s2509_s1 + $0x1c] sm:$0xf]  ;;  %v17_v15 = vld [vmem:[%s2510_s0 + $0xc] sm:$0x3] }
   0x6   :  { %2021 = vmatpush3.msk.msra.mxu0 %vm63_vm0, %v37_v5  ;;  %2026 = vmatpush3.msk.msra.mxu1 %vm63_vm0, %v38_v6  ;;  %v18_v16 = vld [vmem:[%s2510_s0 + $0xe] sm:$0x3]  ;;  %v43_v17 = vld [vmem:[%s2509_s1 + $0x20] sm:$0xf]  ;;  %v44_v18 = vld [vmem:[%s2509_s1 + $0x24] sm:$0xf] }
   0x7   :  { %2022 = vmatprep.mubr.msk.f32.mxu0 %vm2133_vm2, %v2132_v0  ;;  %2027 = vmatprep.mubr.msk.f32.mxu1 %vm2133_vm2, %v2132_v0  ;;  %v19_v19 = vld [vmem:[%s2510_s0 + $0x10] sm:$0x3]  ;;  %v20_v20 = vld [vmem:[%s2510_s0 + $0x12] sm:$0x3]  ;;  %v45_v21 = vld [vmem:[%s2509_s1 + $0x28] sm:$0xf] }
   0x8   :  { %2023 = vmatmul.mubr.msk.f32.vlgmr.msra.gmra.mxu0 %vm59_vm1, %v13_v7  ;;  %2028 = vmatmul.mubr.msk.f32.vlgmr.msra.gmra.mxu1 %vm59_vm1, %v14_v8  ;;  %v46_v22 = vld [vmem:[%s2509_s1 + $0x2c] sm:$0xf]  ;;  %v21_v23 = vld [vmem:[%s2510_s0 + $0x14] sm:$0x3]  ;;  %v22_v24 = vld [vmem:[%s2510_s0 + $0x16] sm:$0x3] }
   0x9   :  { %2030 = vmatprep.subr.mxu0 %v2132_v0  ;;  %2035 = vmatprep.subr.mxu1 %v2132_v0  ;;  %v47_v25 = vld [vmem:[%s2509_s1 + $0x30] sm:$0xf]  ;;  %v48_v26 = vld [vmem:[%s2509_s1 + $0x34] sm:$0xf]  ;;  %v23_v27 = vld [vmem:[%s2510_s0 + $0x18] sm:$0x3] }
   0xa   :  { %2031 = vmatpush3.msk.msra.mxu0 %vm63_vm0, %v39_v9  ;;  %2036 = vmatpush3.msk.msra.mxu1 %vm63_vm0, %v40_v10  ;;  %v24_v28 = vld [vmem:[%s2510_s0 + $0x1a] sm:$0x3]  ;;  %v50_v30 = vld [vmem:[%s2509_s1 + $0x3c] sm:$0xf]  ;;  %v51_v33 = vld [vmem:[%s2509_s1 + $0x40] sm:$0xf] }
   0xb   :  { %2032 = vmatprep.mubr.msk.f32.mxu0 %vm2133_vm2, %v2132_v0  ;;  %2037 = vmatprep.mubr.msk.f32.mxu1 %vm2133_vm2, %v2132_v0  ;;  %v49_v29 = vld [vmem:[%s2509_s1 + $0x38] sm:$0xf]  ;;  %v25_v31 = vld [vmem:[%s2510_s0 + $0x1c] sm:$0x3]  ;;  %v26_v32 = vld [vmem:[%s2510_s0 + $0x1e] sm:$0x3] }
   0xc   :  { %2033 = vmatmul.mubr.msk.f32.vlgmr.msra.gmra.mxu0 %vm59_vm1, %v15_v11  ;;  %2038 = vmatmul.mubr.msk.f32.vlgmr.msra.gmra.mxu1 %vm59_vm1, %v16_v12  ;;  %v52_v34 = vld [vmem:[%s2509_s1 + $0x44] sm:$0xf]  ;;  %v27_v35 = vld [vmem:[%s2510_s0 + $0x20] sm:$0x3]  ;;  %v28_v36 = vld [vmem:[%s2510_s0 + $0x22] sm:$0x3] }
   0xd   :  { %2040 = vmatprep.subr.mxu0 %v2132_v0  ;;  %2045 = vmatprep.subr.mxu1 %v2132_v0  ;;  %v53_v37 = vld [vmem:[%s2509_s1 + $0x48] sm:$0xf]  ;;  %v54_v38 = vld [vmem:[%s2509_s1 + $0x4c] sm:$0xf]  ;;  %v29_v39 = vld [vmem:[%s2510_s0 + $0x24] sm:$0x3] }
   0xe   :  { %2041 = vmatpush3.msk.msra.mxu0 %vm63_vm0, %v41_v13  ;;  %2046 = vmatpush3.msk.msra.mxu1 %vm63_vm0, %v42_v14  ;;  %v30_v40 = vld [vmem:[%s2510_s0 + $0x26] sm:$0x3]  ;;  %v55_v41 = vld [vmem:[%s2509_s1 + $0x50] sm:$0xf]  ;;  %v56_v42 = vld [vmem:[%s2509_s1 + $0x54] sm:$0xf] }
   0xf   :  { %2042 = vmatprep.mubr.msk.f32.mxu0 %vm2133_vm2, %v2132_v0  ;;  %2047 = vmatprep.mubr.msk.f32.mxu1 %vm2133_vm2, %v2132_v0  ;;  %v31_v43 = vld [vmem:[%s2510_s0 + $0x28] sm:$0x3]  ;;  %v32_v44 = vld [vmem:[%s2510_s0 + $0x2a] sm:$0x3]  ;;  %v57_v45 = vld [vmem:[%s2509_s1 + $0x58] sm:$0xf] }
  0x10   :  { %2043 = vmatmul.mubr.msk.f32.vlgmr.msra.gmra.mxu0 %vm59_vm1, %v17_v15  ;;  %2048 = vmatmul.mubr.msk.f32.vlgmr.msra.gmra.mxu1 %vm59_vm1, %v18_v16  ;;  %v58_v46 = vld [vmem:[%s2509_s1 + $0x5c] sm:$0xf]  ;;  %v33_v47 = vld [vmem:[%s2510_s0 + $0x2c] sm:$0x3]  ;;  %v34_v48 = vld [vmem:[%s2510_s0 + $0x2e] sm:$0x3] }
  0x11   :  { %2050 = vmatprep.subr.mxu0 %v2132_v0  ;;  %2055 = vmatprep.subr.mxu1 %v2132_v0  ;;  %vm1885_vm3 = vcmask 25600  }
  0x12   :  { %2051 = vmatpush3.msk.msra.mxu0 %vm63_vm0, %v43_v17  ;;  %2056 = vmatpush3.msk.msra.mxu1 %vm63_vm0, %v44_v18 }
  0x13   :  { %2052 = vmatprep.mubr.msk.f32.mxu0 %vm2133_vm2, %v2132_v0  ;;  %2057 = vmatprep.mubr.msk.f32.mxu1 %vm2133_vm2, %v2132_v0 }
  0x14   :  { %2053 = vmatmul.mubr.msk.f32.vlgmr.msra.gmra.mxu0 %vm59_vm1, %v19_v19  ;;  %2058 = vmatmul.mubr.msk.f32.vlgmr.msra.gmra.mxu1 %vm59_vm1, %v20_v20 }
  0x15   :  { %2060 = vmatprep.subr.mxu0 %v2132_v0  ;;  %2065 = vmatprep.subr.mxu1 %v2132_v0 }
  0x16   :  { %2061 = vmatpush3.msk.msra.mxu0 %vm63_vm0, %v45_v21  ;;  %2066 = vmatpush3.msk.msra.mxu1 %vm63_vm0, %v46_v22 }
  0x17   :  { %2062 = vmatprep.mubr.msk.f32.mxu0 %vm2133_vm2, %v2132_v0  ;;  %2067 = vmatprep.mubr.msk.f32.mxu1 %vm2133_vm2, %v2132_v0 }
  0x18   :  { %2063 = vmatmul.mubr.msk.f32.vlgmr.msra.gmra.mxu0 %vm59_vm1, %v21_v23  ;;  %2068 = vmatmul.mubr.msk.f32.vlgmr.msra.gmra.mxu1 %vm59_vm1, %v22_v24 }
  0x19   :  { %2070 = vmatprep.subr.mxu0 %v2132_v0  ;;  %2075 = vmatprep.subr.mxu1 %v2132_v0 }
  0x1a   :  { %2071 = vmatpush3.msk.msra.mxu0 %vm63_vm0, %v47_v25  ;;  %2076 = vmatpush3.msk.msra.mxu1 %vm63_vm0, %v48_v26 }
  0x1b   :  { %2072 = vmatprep.mubr.msk.f32.mxu0 %vm2133_vm2, %v2132_v0  ;;  %2077 = vmatprep.mubr.msk.f32.mxu1 %vm2133_vm2, %v2132_v0 }
  0x1c   :  { %2073 = vmatmul.mubr.msk.f32.vlgmr.msra.gmra.mxu0 %vm59_vm1, %v23_v27  ;;  %2078 = vmatmul.mubr.msk.f32.vlgmr.msra.gmra.mxu1 %vm59_vm1, %v24_v28 }
  0x1d   :  { %2080 = vmatprep.subr.mxu0 %v2132_v0  ;;  %2085 = vmatprep.subr.mxu1 %v2132_v0 }
  0x1e   :  { %2081 = vmatpush3.msk.msra.mxu0 %vm63_vm0, %v49_v29  ;;  %2086 = vmatpush3.msk.msra.mxu1 %vm63_vm0, %v50_v30 }
  0x1f   :  { %2082 = vmatprep.mubr.msk.f32.mxu0 %vm2133_vm2, %v2132_v0  ;;  %2087 = vmatprep.mubr.msk.f32.mxu1 %vm2133_vm2, %v2132_v0 }
  0x20   :  { %2083 = vmatmul.mubr.msk.f32.vlgmr.msra.gmra.mxu0 %vm59_vm1, %v25_v31  ;;  %2088 = vmatmul.mubr.msk.f32.vlgmr.msra.gmra.mxu1 %vm59_vm1, %v26_v32 }
  0x21   :  { %2090 = vmatprep.subr.mxu0 %v2132_v0  ;;  %2095 = vmatprep.subr.mxu1 %v2132_v0 }
  0x22   :  { %2091 = vmatpush3.msk.msra.mxu0 %vm63_vm0, %v51_v33  ;;  %2096 = vmatpush3.msk.msra.mxu1 %vm63_vm0, %v52_v34 }
  0x23   :  { %2092 = vmatprep.mubr.msk.f32.mxu0 %vm2133_vm2, %v2132_v0  ;;  %2097 = vmatprep.mubr.msk.f32.mxu1 %vm2133_vm2, %v2132_v0 }
  0x24   :  { %2093 = vmatmul.mubr.msk.f32.vlgmr.msra.gmra.mxu0 %vm59_vm1, %v27_v35  ;;  %2098 = vmatmul.mubr.msk.f32.vlgmr.msra.gmra.mxu1 %vm59_vm1, %v28_v36 }
  0x25   :  { %2100 = vmatprep.subr.mxu0 %v2132_v0  ;;  %2105 = vmatprep.subr.mxu1 %v2132_v0 }
  0x26   :  { %2101 = vmatpush3.msk.msra.mxu0 %vm63_vm0, %v53_v37  ;;  %2106 = vmatpush3.msk.msra.mxu1 %vm63_vm0, %v54_v38 }
  0x27   :  { %2102 = vmatprep.mubr.msk.f32.mxu0 %vm2133_vm2, %v2132_v0  ;;  %2107 = vmatprep.mubr.msk.f32.mxu1 %vm2133_vm2, %v2132_v0 }
  0x28   :  { %2103 = vmatmul.mubr.msk.f32.vlgmr.msra.gmra.mxu0 %vm59_vm1, %v29_v39  ;;  %2108 = vmatmul.mubr.msk.f32.vlgmr.msra.gmra.mxu1 %vm59_vm1, %v30_v40 }
  0x29   :  { %2110 = vmatprep.subr.mxu0 %v2132_v0  ;;  %2115 = vmatprep.subr.mxu1 %v2132_v0 }
  0x2a   :  { %2111 = vmatpush3.msk.msra.mxu0 %vm63_vm0, %v55_v41  ;;  %2116 = vmatpush3.msk.msra.mxu1 %vm63_vm0, %v56_v42 }
  0x2b   :  { %2112 = vmatprep.mubr.msk.f32.mxu0 %vm2133_vm2, %v2132_v0  ;;  %2117 = vmatprep.mubr.msk.f32.mxu1 %vm2133_vm2, %v2132_v0 }
  0x2c   :  { %2113 = vmatmul.mubr.msk.f32.vlgmr.msra.gmra.mxu0 %vm59_vm1, %v31_v43  ;;  %2118 = vmatmul.mubr.msk.f32.vlgmr.msra.gmra.mxu1 %vm59_vm1, %v32_v44 }
  0x2d   :  { %2120 = vmatprep.subr.mxu0 %v2132_v0  ;;  %2125 = vmatprep.subr.mxu1 %v2132_v0 }
  0x2e   :  { %2121 = vmatpush3.msk.msra.mxu0 %vm63_vm0, %v57_v45  ;;  %2126 = vmatpush3.msk.msra.mxu1 %vm63_vm0, %v58_v46 }
  0x2f   :  { %2122 = vmatprep.mubr.msk.f32.mxu0 %vm2133_vm2, %v2132_v0  ;;  %2127 = vmatprep.mubr.msk.f32.mxu1 %vm2133_vm2, %v2132_v0 }
  0x30   :  { %2123 = vmatmul.mubr.msk.f32.vlgmr.msra.gmra.mxu0 %vm59_vm1, %v33_v47  ;;  %2128 = vmatmul.mubr.msk.f32.vlgmr.msra.gmra.mxu1 %vm59_vm1, %v34_v48 }
  0xc4   :  { %v133_v49 = vpop.f32.mrf.mxu0  ;;  %v209_v50 = vpop.f32.mrf.mxu1 }
  0xc5   :  { %1886 = vst.msk [vmem:[%s2511_s2] sm:$0x3] %vm1885_vm3, %v133_v49  ;;  %1887 = vst.msk [vmem:[%s2511_s2 + $0x2] sm:$0x3] %vm1885_vm3, %v209_v50 }
  0xc6   :  { %v2014_v51 = vpop.f32.mrf.mxu0  ;;  %v2019_v52 = vpop.f32.mrf.mxu1 }
  0xc8   :  { %v285_v53 = vpop.f32.mrf.mxu0  ;;  %v361_v54 = vpop.f32.mrf.mxu1 }
  0xc9   :  { %1888 = vst.msk [vmem:[%s2511_s2 + $0x4] sm:$0x3] %vm1885_vm3, %v285_v53  ;;  %1889 = vst.msk [vmem:[%s2511_s2 + $0x6] sm:$0x3] %vm1885_vm3, %v361_v54 }
  0xca   :  { %v2024_v55 = vpop.f32.mrf.mxu0  ;;  %v2029_v56 = vpop.f32.mrf.mxu1 }
  0xcc   :  { %v437_v57 = vpop.f32.mrf.mxu0  ;;  %v513_v58 = vpop.f32.mrf.mxu1 }
  0xcd   :  { %1890 = vst.msk [vmem:[%s2511_s2 + $0x8] sm:$0x3] %vm1885_vm3, %v437_v57  ;;  %1891 = vst.msk [vmem:[%s2511_s2 + $0xa] sm:$0x3] %vm1885_vm3, %v513_v58 }
  0xce   :  { %v2034_v59 = vpop.f32.mrf.mxu0  ;;  %v2039_v60 = vpop.f32.mrf.mxu1 }
  0xd0   :  { %v589_v61 = vpop.f32.mrf.mxu0  ;;  %v665_v62 = vpop.f32.mrf.mxu1 }
  0xd1   :  { %1892 = vst.msk [vmem:[%s2511_s2 + $0xc] sm:$0x3] %vm1885_vm3, %v589_v61  ;;  %1893 = vst.msk [vmem:[%s2511_s2 + $0xe] sm:$0x3] %vm1885_vm3, %v665_v62 }
  0xd2   :  { %v2044_v63 = vpop.f32.mrf.mxu0  ;;  %v2049_v0 = vpop.f32.mrf.mxu1 }
  0xd4   :  { %v741_v1 = vpop.f32.mrf.mxu0  ;;  %v817_v2 = vpop.f32.mrf.mxu1 }
  0xd5   :  { %1894 = vst.msk [vmem:[%s2511_s2 + $0x10] sm:$0x3] %vm1885_vm3, %v741_v1  ;;  %1895 = vst.msk [vmem:[%s2511_s2 + $0x12] sm:$0x3] %vm1885_vm3, %v817_v2 }
  0xd6   :  { %v2054_v3 = vpop.f32.mrf.mxu0  ;;  %v2059_v4 = vpop.f32.mrf.mxu1 }
  0xd8   :  { %v893_v5 = vpop.f32.mrf.mxu0  ;;  %v969_v6 = vpop.f32.mrf.mxu1 }
  0xd9   :  { %1896 = vst.msk [vmem:[%s2511_s2 + $0x14] sm:$0x3] %vm1885_vm3, %v893_v5  ;;  %1897 = vst.msk [vmem:[%s2511_s2 + $0x16] sm:$0x3] %vm1885_vm3, %v969_v6 }
  0xda   :  { %v2064_v7 = vpop.f32.mrf.mxu0  ;;  %v2069_v8 = vpop.f32.mrf.mxu1 }
  0xdc   :  { %v1045_v9 = vpop.f32.mrf.mxu0  ;;  %v1121_v10 = vpop.f32.mrf.mxu1 }
  0xdd   :  { %1898 = vst.msk [vmem:[%s2511_s2 + $0x18] sm:$0x3] %vm1885_vm3, %v1045_v9  ;;  %1899 = vst.msk [vmem:[%s2511_s2 + $0x1a] sm:$0x3] %vm1885_vm3, %v1121_v10 }
  0xde   :  { %v2074_v11 = vpop.f32.mrf.mxu0  ;;  %v2079_v12 = vpop.f32.mrf.mxu1 }
  0xe0   :  { %v1197_v13 = vpop.f32.mrf.mxu0  ;;  %v1273_v14 = vpop.f32.mrf.mxu1 }
  0xe1   :  { %1900 = vst.msk [vmem:[%s2511_s2 + $0x1c] sm:$0x3] %vm1885_vm3, %v1197_v13  ;;  %1901 = vst.msk [vmem:[%s2511_s2 + $0x1e] sm:$0x3] %vm1885_vm3, %v1273_v14 }
  0xe2   :  { %v2084_v15 = vpop.f32.mrf.mxu0  ;;  %v2089_v16 = vpop.f32.mrf.mxu1 }
  0xe4   :  { %v1349_v17 = vpop.f32.mrf.mxu0  ;;  %v1425_v18 = vpop.f32.mrf.mxu1 }
  0xe5   :  { %1902 = vst.msk [vmem:[%s2511_s2 + $0x20] sm:$0x3] %vm1885_vm3, %v1349_v17  ;;  %1903 = vst.msk [vmem:[%s2511_s2 + $0x22] sm:$0x3] %vm1885_vm3, %v1425_v18 }
  0xe6   :  { %v2094_v19 = vpop.f32.mrf.mxu0  ;;  %v2099_v20 = vpop.f32.mrf.mxu1 }
  0xe8   :  { %v1501_v21 = vpop.f32.mrf.mxu0  ;;  %v1577_v22 = vpop.f32.mrf.mxu1 }
  0xe9   :  { %1904 = vst.msk [vmem:[%s2511_s2 + $0x24] sm:$0x3] %vm1885_vm3, %v1501_v21  ;;  %1905 = vst.msk [vmem:[%s2511_s2 + $0x26] sm:$0x3] %vm1885_vm3, %v1577_v22 }
  0xea   :  { %v2104_v23 = vpop.f32.mrf.mxu0  ;;  %v2109_v24 = vpop.f32.mrf.mxu1 }
  0xec   :  { %v1653_v25 = vpop.f32.mrf.mxu0  ;;  %v1729_v26 = vpop.f32.mrf.mxu1 }
  0xed   :  { %1906 = vst.msk [vmem:[%s2511_s2 + $0x28] sm:$0x3] %vm1885_vm3, %v1653_v25  ;;  %1907 = vst.msk [vmem:[%s2511_s2 + $0x2a] sm:$0x3] %vm1885_vm3, %v1729_v26 }
  0xee   :  { %v2114_v27 = vpop.f32.mrf.mxu0  ;;  %v2119_v28 = vpop.f32.mrf.mxu1 }
  0xf0   :  { %v1805_v29 = vpop.f32.mrf.mxu0  ;;  %v1881_v30 = vpop.f32.mrf.mxu1 }
  0xf1   :  { %1908 = vst.msk [vmem:[%s2511_s2 + $0x2c] sm:$0x3] %vm1885_vm3, %v1805_v29  ;;  %1909 = vst.msk [vmem:[%s2511_s2 + $0x2e] sm:$0x3] %vm1885_vm3, %v1881_v30 }
  0xf2   :  { %v2124_v31 = vpop.f32.mrf.mxu0  ;;  %v2129_v32 = vpop.f32.mrf.mxu1 }

// kernel: wave_conv1d_forward.11
= control target key start
LH: loop header
LB: loop body
LE: loop exit
PB: predicated region body
PF: predicated region fallthrough
CT: control target
= control target key end

     0   :  { %s488_s12 = smov 0   ;;  %s517_s0 = inlined_call_operand.vmem [shape: f32[2,4,37], index: 0, kind: input, shape index: {}]   ;;  %s518_s1 = inlined_call_operand.vmem [shape: f32[2,4,37], index: 1, kind: input, shape index: {}]   ;;  %s519_s2 = inlined_call_operand.vmem [shape: f32[2,4,32], index: 2, kind: output, shape index: {0}]   ;;  %s520_s3 = inlined_call_operand.vmem [shape: f32[2,4,32], index: 3, kind: output, shape index: {1}]  }
   0x1 LB: > { %s429_s13 = sadd.s32 4294967295, %s460_s12   ;;  %p433_p0 = scmp.ge.s32.totalorder %s460_s12, 1  ;;  %s460_s12 = sphi %s488_s12, %s14_s12  }
   0x2   : > { %p148_p1 = scmp.lt.s32.totalorder %s460_s12, 3 }
   0x4   : > { %p149_p2 = pnand %p433_p0, %p148_p1 }
   0x5   : > { %p178_p3 = scmp.lt.s32.totalorder (!%p149_p2), %s429_s13, 1  ;;  %s462_s21 = smov (!%p149_p2), 1  }
   0x6   : > { %152 = sbr.rel (%p149_p2) target bundleno = 287 (0x11f), region = 28  ;;  %s463_s22 = smov (!%p149_p2), 2  }
   0x7   : > { %s464_s23 = smov (!%p149_p2), 3   ;;  %s465_s24 = smov (!%p149_p2), 4  }
   0x8   : > { %s466_s25 = smov (!%p149_p2), 5   ;;  %s467_s26 = smov (!%p149_p2), 123  }
   0xb   : > { %s522_s13 = smov (!%p178_p3, %s429_s13), 1  ;;  %vm326_vm0 = vcmask 257024  }
   0xc   : > { %s496_s14 = sshll.u32 %s522_s13, 2 }
   0xd   : > { %s185_s17 = scalar_lea.vmem %s518_s1, %s496_s14  ;;  %s181_s20 = scalar_lea.vmem %s517_s0, %s496_s14 }
   0xe   : > { %v195_v0 = vld [vmem:[%s185_s17] sm:$0xf]  ;;  %s193_s29 = scalar_lea.vmem %s520_s3, %s496_s14  ;;  %s189_s5 = scalar_lea.vmem %s519_s2, %s496_s14 }
   0xf   : > { %v194_v1 = vld [vmem:[%s181_s20] sm:$0xf]  ;;  %v208_v2 = vmul.f32 0.0005538422, %v195_v0  ;;  %v220_v4 = vmul.f32 0.03158204, %v195_v0 }
  0x10   : > { %v202_v3 = vmul.f32 0.7511339, %v194_v1  ;;  %v214_v5 = vmul.f32 0.31525034, %v194_v1  ;;  %v238_v6 = vmul.f32 -0.12976687, %v194_v1 }
  0x11   : > { %210 = vrot.lane.b32.xlu1 %v208_v2, %s462_s21  ;;  %v226_v7 = vmul.f32 -0.2262647, %v194_v1  ;;  %v197_v8 = vmul.f32 -0.0010773011, %v195_v0  ;;  %v196_v9 = vmul.f32 0.11154074, %v194_v1 }
  0x12   : > { %204 = vrot.lane.b32.xlu0 %v202_v3, %s462_s21  ;;  %v200_v10 = vmul.f32 -0.0047772573, %v195_v0  ;;  %v199_v11 = vmul.f32 0.4946239, %v194_v1  ;;  %v244_v14 = vmul.f32 -0.097501606, %v195_v0 }
  0x13   : > { %v198_v12 = vadd.f32 %v197_v8, %v196_v9  ;;  %v232_v15 = vmul.f32 0.027522866, %v195_v0  ;;  %v262_v16 = vmul.f32 0.027522866, %v194_v1  ;;  %v250_v17 = vmul.f32 0.097501606, %v194_v1 }
  0x14   : > { %v201_v13 = vadd.f32 %v200_v10, %v199_v11  ;;  %v268_v18 = vmul.f32 0.2262647, %v195_v0  ;;  %v256_v19 = vmul.f32 -0.12976687, %v195_v0  ;;  %v286_v20 = vmul.f32 0.0005538422, %v194_v1 }
  0x15   : > { %222 = vrot.lane.b32.xlu1 %v220_v4, %s462_s21  ;;  %v274_v21 = vmul.f32 -0.03158204, %v194_v1  ;;  %v292_v22 = vmul.f32 -0.7511339, %v195_v0  ;;  %v280_v23 = vmul.f32 0.31525034, %v195_v0 }
  0x16   : > { %216 = vrot.lane.b32.xlu0 %v214_v5, %s462_s21  ;;  %v310_v24 = vmul.f32 -0.0010773011, %v194_v1  ;;  %v298_v25 = vmul.f32 0.0047772573, %v194_v1  ;;  %v316_v26 = vmul.f32 -0.11154074, %v195_v0 }
  0x17   : > { %v304_v27 = vmul.f32 0.4946239, %v195_v0 }
  0x19   : > { %240 = vrot.lane.b32.xlu1 %v238_v6, %s463_s22 }
  0x1a   : > { %228 = vrot.lane.b32.xlu0 %v226_v7, %s463_s22 }
  0x1d   : > { %246 = vrot.lane.b32.xlu1 %v244_v14, %s463_s22 }
  0x1e   : > { %234 = vrot.lane.b32.xlu0 %v232_v15, %s463_s22 }
  0x21   : > { %264 = vrot.lane.b32.xlu1 %v262_v16, %s464_s23 }
  0x22   : > { %252 = vrot.lane.b32.xlu0 %v250_v17, %s464_s23 }
  0x25   : > { %270 = vrot.lane.b32.xlu1 %v268_v18, %s464_s23 }
  0x26   : > { %258 = vrot.lane.b32.xlu0 %v256_v19, %s464_s23 }
  0x29   : > { %288 = vrot.lane.b32.xlu1 %v286_v20, %s465_s24 }
  0x2a   : > { %276 = vrot.lane.b32.xlu0 %v274_v21, %s465_s24 }
  0x2d   : > { %294 = vrot.lane.b32.xlu1 %v292_v22, %s465_s24 }
  0x2e   : > { %282 = vrot.lane.b32.xlu0 %v280_v23, %s465_s24 }
  0x31   : > { %312 = vrot.lane.b32.xlu1 %v310_v24, %s466_s25 }
  0x32   : > { %300 = vrot.lane.b32.xlu0 %v298_v25, %s466_s25 }
  0x35   : > { %318 = vrot.lane.b32.xlu1 %v316_v26, %s466_s25 }
  0x36   : > { %306 = vrot.lane.b32.xlu0 %v304_v27, %s466_s25 }
  0x83   : > { %v211_v28 = vpop.permute.xlu1 %210 }
  0x84   : > { %v205_v29 = vpop.permute.xlu0 %204 }
  0x85   : > { %v207_v39 = vadd.f32 %v205_v29, %v198_v12 }
  0x87   : > { %v223_v30 = vpop.permute.xlu1 %222  ;;  %v213_v43 = vadd.f32 %v211_v28, %v207_v39 }
  0x88   : > { %v217_v31 = vpop.permute.xlu0 %216 }
  0x89   : > { %v219_v36 = vadd.f32 %v217_v31, %v201_v13 }
  0x8b   : > { %v241_v32 = vpop.permute.xlu1 %240  ;;  %v225_v40 = vadd.f32 %v223_v30, %v219_v36 }
  0x8c   : > { %v229_v33 = vpop.permute.xlu0 %228 }
  0x8d   : > { %v243_v44 = vadd.f32 %v241_v32, %v225_v40  ;;  %v231_v45 = vadd.f32 %v229_v33, %v213_v43 }
  0x8f   : > { %v247_v34 = vpop.permute.xlu1 %246 }
  0x90   : > { %v235_v35 = vpop.permute.xlu0 %234  ;;  %v249_v48 = vadd.f32 %v247_v34, %v243_v44 }
  0x91   : > { %v237_v49 = vadd.f32 %v235_v35, %v231_v45 }
  0x93   : > { %v265_v37 = vpop.permute.xlu1 %264 }
  0x94   : > { %v253_v38 = vpop.permute.xlu0 %252  ;;  %v267_v50 = vadd.f32 %v265_v37, %v249_v48 }
  0x95   : > { %v255_v51 = vadd.f32 %v253_v38, %v237_v49 }
  0x97   : > { %v271_v41 = vpop.permute.xlu1 %270 }
  0x98   : > { %v259_v42 = vpop.permute.xlu0 %258  ;;  %v273_v54 = vadd.f32 %v271_v41, %v267_v50 }
  0x99   : > { %v261_v55 = vadd.f32 %v259_v42, %v255_v51 }
  0x9b   : > { %v289_v46 = vpop.permute.xlu1 %288 }
  0x9c   : > { %v277_v47 = vpop.permute.xlu0 %276  ;;  %v291_v56 = vadd.f32 %v289_v46, %v273_v54 }
  0x9d   : > { %v279_v57 = vadd.f32 %v277_v47, %v261_v55 }
  0x9f   : > { %v295_v52 = vpop.permute.xlu1 %294 }
  0xa0   : > { %v283_v53 = vpop.permute.xlu0 %282  ;;  %v297_v60 = vadd.f32 %v295_v52, %v291_v56 }
  0xa1   : > { %v285_v61 = vadd.f32 %v283_v53, %v279_v57 }
  0xa3   : > { %v313_v58 = vpop.permute.xlu1 %312 }
  0xa4   : > { %v301_v59 = vpop.permute.xlu0 %300  ;;  %v315_v62 = vadd.f32 %v313_v58, %v297_v60 }
  0xa5   : > { %v303_v63 = vadd.f32 %v301_v59, %v285_v61 }
  0xa7   : > { %v319_v0 = vpop.permute.xlu1 %318 }
  0xa8   : > { %v307_v1 = vpop.permute.xlu0 %306  ;;  %v321_v2 = vadd.f32 %v319_v0, %v315_v62 }
  0xa9   : > { %v309_v3 = vadd.f32 %v307_v1, %v303_v63 }
  0xaa   : > { %329 = vrot.lane.b32.xlu1 %v321_v2, %s467_s26 }
  0xab   : > { %323 = vrot.lane.b32.xlu0 %v309_v3, %s467_s26 }
 0x11c   : > { %v330_v4 = vpop.permute.xlu1 %329 }
 0x11d   : > { %v324_v5 = vpop.permute.xlu0 %323  ;;  %332 = vst.msk [vmem:[%s193_s29] sm:$0xf] %vm326_vm0, %v330_v4 }
 0x11e   : > { %327 = vst.msk [vmem:[%s189_s5] sm:$0xf] %vm326_vm0, %v324_v5 }
 0x11f PF: > { %s14_s12 = sadd.s32 1, %s460_s12  }
 0x120   : > { %p11_p4 = scmp.ge.s32.totalorder %s14_s12, 4  }
 0x122   :  { %13 = sbr.rel (!%p11_p4) target bundleno = 1 (0x1), region = 73 }

</bundles_post_ra>
